<compile_context>
chip_gen: v7x
topology: tpu7x:2x2x1
jax: 0.10.0
libtpu: 0.0.40
codegen_flags: <defaults>
</compile_context>

<pallas_src>
import functools

import jax
import jax.numpy as jnp
from jax import lax
from jax.experimental import pallas as pl
from jax.experimental.pallas import tpu as pltpu

_H1 = 16                    # layer-1 hidden size
_H2 = 1                     # layer-2 hidden size
_L2_OFF = 4 * _H1           # lane offset of the 4 layer-2 gates (64)
_LANES = 128                # one vreg lane width; all gates of both layers fit
_VMEM = pl.BlockSpec(memory_space=pltpu.MemorySpace.VMEM)


def _vd_decoder_kernel(x_ref, wih1_ref, b1_ref, wfused_ref, whh2_ref, b2_ref,
                       out_ref, xp_ref):
    """Fused 2-layer LSTM (1 -> 16 -> 1) forward, time-major, skewed loop.

    x_ref      : (T, B, 1)    input sequence (time-major)
    wih1_ref   : (1, 1, 128)  layer-1 input weights, gate-packed in lanes 0..63
    b1_ref     : (1, 1, 128)  layer-1 combined bias,  gate-packed in lanes 0..63
    wfused_ref : (16, 128)    [Whh1 -> lanes 0..63 | Wih2 -> lanes 64..67]
    whh2_ref   : (1, 128)     layer-2 recurrent weights in lanes 64..67
    b2_ref     : (1, 128)     layer-2 combined bias    in lanes 64..67
    out_ref    : (B, T)       layer-2 hidden (H2 == 1) for every timestep
    xp_ref     : (T, B, 128)  VMEM scratch: hoisted layer-1 input projection

    Invariants (all static, enforced by pack_vd_decoder_params):
      * cell-candidate (g) lanes of every packed weight/bias are pre-scaled
        by 2, so one sigmoid covers all gates via tanh(z) = 2*sigmoid(2z) - 1;
      * lanes 68..127 of every packed operand are exactly zero.
    """
    T, B, _ = x_ref.shape
    H1 = wfused_ref.shape[0]                 # 16 (true contraction size)
    G = wfused_ref.shape[1]                  # 128
    L2 = 4 * H1                              # 64: lane offset of layer-2 gates

    # ---- Hoisted layer-1 input projection + combined bias (I1 == 1 -> VPU) --
    xp_ref[...] = x_ref[...] * wih1_ref[...] + b1_ref[...]

    # ---- Loop-invariant values (hoisted; JAX does not CSE broadcasts) -------
    wfused = wfused_ref[...]                                 # (16, 128)
    whh2 = whh2_ref[...]                                     # (1, 128)
    b2 = b2_ref[...]                                         # (1, 128)
    col_t = lax.broadcasted_iota(jnp.int32, (B, T), 1)       # output lane index

    def step(t, carry):
        # fused_prev = h1_{t-1} @ [Whh1 | Wih2]   (zeros for t == 0)
        fused_prev, c1, h2, c2, out_acc = carry

        # ----- layer 1, step t: ONE sigmoid over one (B, 128) vreg -----------
        s1 = jax.nn.sigmoid(xp_ref[t] + fused_prev)
        i1 = s1[:, 0 * H1:1 * H1]
        f1 = s1[:, 1 * H1:2 * H1]
        g1 = 2.0 * s1[:, 2 * H1:3 * H1] - 1.0      # tanh via pre-scaled sigmoid
        o1 = s1[:, 3 * H1:4 * H1]
        c1 = f1 * c1 + i1 * g1
        h1 = o1 * jnp.tanh(c1)                     # (B, 16) — no padding lanes

        # ----- single fused MXU call (K = 16, de-padded weights) -------------
        #   lanes 0..63 : layer-1 recurrent gates for step t+1
        #   lanes 64..67: layer-2 input-projection gates for step t
        fused = jnp.dot(h1, wfused, preferred_element_type=jnp.float32)

        # ----- layer 2, step t: recurrence is a VPU broadcast (H2 == 1) ------
        s2 = jax.nn.sigmoid(fused + h2 * whh2 + b2)
        i2 = s2[:, L2 + 0:L2 + 1]
        f2 = s2[:, L2 + 1:L2 + 2]
        g2 = 2.0 * s2[:, L2 + 2:L2 + 3] - 1.0
        o2 = s2[:, L2 + 3:L2 + 4]
        c2 = f2 * c2 + i2 * g2
        h2 = o2 * jnp.tanh(c2)                     # (B, 1)

        # ----- accumulate output in vregs; single store after the loop -------
        out_acc = jnp.where(col_t == t, jnp.broadcast_to(h2, (B, T)), out_acc)
        return fused, c1, h2, c2, out_acc

    carry0 = (jnp.zeros((B, G), jnp.float32),      # fused_prev (h1_init == 0)
              jnp.zeros((B, H1), jnp.float32),     # c1
              jnp.zeros((B, 1), jnp.float32),      # h2
              jnp.zeros((B, 1), jnp.float32),      # c2
              jnp.zeros((B, T), jnp.float32))      # per-step outputs
    # T is small and static: fully unroll so the scheduler can overlap the
    # layer-2 tail of step t with the (independent) layer-1 head of step t+1.
    carry = lax.fori_loop(0, T, step, carry0, unroll=True)
    out_ref[...] = carry[4]


def _pack_l1(w_t):
    """(K, 4*H1) in [i,f,g,o] order -> (K, 128): lanes 0..63, g-cols pre-scaled x2."""
    k = w_t.shape[0]
    w_t = w_t.astype(jnp.float32)
    w_t = w_t.at[:, 2 * _H1:3 * _H1].multiply(2.0)     # tanh(z) = 2*sigmoid(2z)-1
    return jnp.zeros((k, _LANES), jnp.float32).at[:, :4 * _H1].set(w_t)


def _pack_l2(w_t):
    """(K, 4) in [i,f,g,o] order -> (K, 128): lanes 64..67, g-col pre-scaled x2."""
    k = w_t.shape[0]
    w_t = w_t.astype(jnp.float32)
    w_t = w_t.at[:, 2:3].multiply(2.0)
    return jnp.zeros((k, _LANES), jnp.float32).at[:, _L2_OFF:_L2_OFF + 4].set(w_t)


def pack_vd_decoder_params(params):
    """One-time weight prep: transpose, combine biases, de-pad, gate-pack, fuse."""
    p1, p2 = params["lstm1"], params["lstm2"]
    wih1 = _pack_l1(p1["w_ih"].T).reshape(1, 1, _LANES)                 # (1,1,128)
    b1 = _pack_l1((p1["b_ih"] + p1["b_hh"]).reshape(1, -1)).reshape(1, 1, _LANES)
    # fused per-step weight: [Whh1 (lanes 0..63) | Wih2 (lanes 64..67)], K = 16
    wfused = _pack_l1(p1["w_hh"].T) + _pack_l2(p2["w_ih"].T)            # (16, 128)
    whh2 = _pack_l2(p2["w_hh"].T)                                       # (1, 128)
    b2 = _pack_l2((p2["b_ih"] + p2["b_hh"]).reshape(1, -1))             # (1, 128)
    return {"wih1": wih1, "b1": b1, "wfused": wfused, "whh2": whh2, "b2": b2}


@jax.jit
def vd_decoder_forward(packed, x):
    """x: (B, T, 1) batch_first (as in the PyTorch module). Returns (B, T, 1)."""
    B, T, _ = x.shape
    x_tm = jnp.transpose(x, (1, 0, 2)).astype(jnp.float32)              # (T, B, 1)

    out_bt = pl.pallas_call(
        _vd_decoder_kernel,
        out_shape=jax.ShapeDtypeStruct((B, T), jnp.float32),
        in_specs=[_VMEM] * 6,
        out_specs=_VMEM,
        scratch_shapes=[pltpu.VMEM((T, B, _LANES), jnp.float32)],
        # No grid: the whole problem (a few tens of KiB of VMEM) fits on one
        # TensorCore.  See module docstring for how to tile if T/B scale up.
    )(x_tm, packed["wih1"], packed["b1"], packed["wfused"],
      packed["whh2"], packed["b2"])

    return out_bt[:, :, None]                                           # (B, T, 1)


def init_vd_decoder_params(key, input_size=1, hidden_size=16):
    """PyTorch-shaped LSTM params, uniform(-1/sqrt(H), 1/sqrt(H)) init."""
    def lstm_params(k, in_sz, hid_sz):
        k1, k2, k3, k4 = jax.random.split(k, 4)
        bound = 1.0 / float(hid_sz) ** 0.5
        u = functools.partial(jax.random.uniform, minval=-bound, maxval=bound,
                              dtype=jnp.float32)
        return {
            "w_ih": u(k1, (4 * hid_sz, in_sz)),
            "w_hh": u(k2, (4 * hid_sz, hid_sz)),
            "b_ih": u(k3, (4 * hid_sz,)),
            "b_hh": u(k4, (4 * hid_sz,)),
        }

    k1, k2 = jax.random.split(key)
    return {
        "lstm1": lstm_params(k1, input_size, hidden_size),
        "lstm2": lstm_params(k2, hidden_size, 1),
    }


def _lstm_ref(x_tm, w_ih, w_hh, b_ih, b_hh):
    H = w_hh.shape[1]
    B = x_tm.shape[1]
    hp = lax.Precision.HIGHEST

    def step(carry, x_t):
        h, c = carry
        gates = (jnp.dot(x_t, w_ih.T, precision=hp)
                 + jnp.dot(h, w_hh.T, precision=hp) + b_ih + b_hh)
        i = jax.nn.sigmoid(gates[:, 0 * H:1 * H])
        f = jax.nn.sigmoid(gates[:, 1 * H:2 * H])
        g = jnp.tanh(gates[:, 2 * H:3 * H])
        o = jax.nn.sigmoid(gates[:, 3 * H:4 * H])
        c = f * c + i * g
        h = o * jnp.tanh(c)
        return (h, c), h

    init = (jnp.zeros((B, H), jnp.float32), jnp.zeros((B, H), jnp.float32))
    _, hs = lax.scan(step, init, x_tm)
    return hs


@jax.jit
def vd_decoder_reference(params, x):
    x_tm = jnp.transpose(x, (1, 0, 2)).astype(jnp.float32)
    p1, p2 = params["lstm1"], params["lstm2"]
    h1 = _lstm_ref(x_tm, p1["w_ih"], p1["w_hh"], p1["b_ih"], p1["b_hh"])
    h2 = _lstm_ref(h1, p2["w_ih"], p2["w_hh"], p2["b_ih"], p2["b_hh"])
    return jnp.transpose(h2, (1, 0, 2))


if __name__ == "__main__":
    key = jax.random.PRNGKey(0)
    k_params, k_x = jax.random.split(key)

    batch, seq, in_feat = 2, 8, 1
    params = init_vd_decoder_params(k_params, input_size=in_feat, hidden_size=16)
    packed = pack_vd_decoder_params(params)          # one-time weight prep
    x = jax.random.normal(k_x, (batch, seq, in_feat), dtype=jnp.float32)

    out = vd_decoder_forward(packed, x)
    jax.block_until_ready(out)

    assert out.shape == (batch, seq, 1), out.shape
    assert out.dtype == jnp.float32

    ref = vd_decoder_reference(params, x)
    max_err = float(jnp.max(jnp.abs(out - ref)))
    # Tight enough to catch gate-packing / lane-offset bugs (O(1e-1)); loose
    # enough to absorb default-precision MXU rounding on the K=16 contraction.
    assert max_err < 5e-3, f"kernel vs reference mismatch: max abs err = {max_err}"

    print("KERNEL_OK")
</pallas_src>

<mosaic_0001>
module attributes {stable_mosaic.version = 11 : i64} {
  func.func @_vd_decoder_kernel(%arg0: memref<8x2x1xf32, #tpu.memory_space<vmem>>, %arg1: memref<1x1x128xf32, #tpu.memory_space<vmem>>, %arg2: memref<1x1x128xf32, #tpu.memory_space<vmem>>, %arg3: memref<16x128xf32, #tpu.memory_space<vmem>>, %arg4: memref<1x128xf32, #tpu.memory_space<vmem>>, %arg5: memref<1x128xf32, #tpu.memory_space<vmem>>, %arg6: memref<2x8xf32, #tpu.memory_space<vmem>>, %arg7: memref<8x2x128xf32, #tpu.memory_space<vmem>>) attributes {dimension_semantics = [], scalar_prefetch = 0 : i64, scratch_operands = 1 : i64, tpu.core_type = #tpu.core_type<tc>} {
    %c0 = arith.constant 0 : index
    %c0_0 = arith.constant 0 : index
    %c0_1 = arith.constant 0 : index
    %0 = vector.load %arg0[%c0, %c0_0, %c0_1] : memref<8x2x1xf32, #tpu.memory_space<vmem>>, vector<8x2x1xf32>
    %c0_2 = arith.constant 0 : index
    %c0_3 = arith.constant 0 : index
    %c0_4 = arith.constant 0 : index
    %1 = vector.load %arg1[%c0_2, %c0_3, %c0_4] : memref<1x1x128xf32, #tpu.memory_space<vmem>>, vector<1x1x128xf32>
    %2 = vector.broadcast %0 : vector<8x2x1xf32> to vector<8x2x128xf32>
    %3 = vector.broadcast %1 : vector<1x1x128xf32> to vector<8x2x128xf32>
    %4 = arith.mulf %2, %3 : vector<8x2x128xf32>
    %c0_5 = arith.constant 0 : index
    %c0_6 = arith.constant 0 : index
    %c0_7 = arith.constant 0 : index
    %5 = vector.load %arg2[%c0_5, %c0_6, %c0_7] : memref<1x1x128xf32, #tpu.memory_space<vmem>>, vector<1x1x128xf32>
    %6 = vector.broadcast %5 : vector<1x1x128xf32> to vector<8x2x128xf32>
    %7 = arith.addf %4, %6 : vector<8x2x128xf32>
    %c0_8 = arith.constant 0 : index
    %c0_9 = arith.constant 0 : index
    %c0_10 = arith.constant 0 : index
    %8 = vector.load %arg7[%c0_8, %c0_9, %c0_10] : memref<8x2x128xf32, #tpu.memory_space<vmem>>, vector<8x2x128xf32>
    tpu.vector_store %arg7[%c0_8, %c0_9, %c0_10], %7 {strides = array<i32>} : memref<8x2x128xf32, #tpu.memory_space<vmem>>, vector<8x2x128xf32>,
    %c0_11 = arith.constant 0 : index
    %c0_12 = arith.constant 0 : index
    %9 = vector.load %arg3[%c0_11, %c0_12] : memref<16x128xf32, #tpu.memory_space<vmem>>, vector<16x128xf32>
    %c0_13 = arith.constant 0 : index
    %c0_14 = arith.constant 0 : index
    %10 = vector.load %arg4[%c0_13, %c0_14] : memref<1x128xf32, #tpu.memory_space<vmem>>, vector<1x128xf32>
    %c0_15 = arith.constant 0 : index
    %c0_16 = arith.constant 0 : index
    %11 = vector.load %arg5[%c0_15, %c0_16] : memref<1x128xf32, #tpu.memory_space<vmem>>, vector<1x128xf32>
    %12 = tpu.iota {dimensions = array<i32: 1>} : vector<2x8xi32>
    %cst = arith.constant 0.000000e+00 : f32
    %13 = vector.broadcast %cst : f32 to vector<2x128xf32>
    %cst_17 = arith.constant 0.000000e+00 : f32
    %14 = vector.broadcast %cst_17 : f32 to vector<2x16xf32>
    %cst_18 = arith.constant 0.000000e+00 : f32
    %15 = vector.broadcast %cst_18 : f32 to vector<2x1xf32>
    %cst_19 = arith.constant 0.000000e+00 : f32
    %16 = vector.broadcast %cst_19 : f32 to vector<2x1xf32>
    %cst_20 = arith.constant 0.000000e+00 : f32
    %17 = vector.broadcast %cst_20 : f32 to vector<2x8xf32>
    %c0_i32 = arith.constant 0 : i32
    %18 = arith.index_cast %c0_i32 : i32 to index
    %c0_21 = arith.constant 0 : index
    %c0_22 = arith.constant 0 : index
    %19 = vector.load %arg7[%18, %c0_21, %c0_22] : memref<8x2x128xf32, #tpu.memory_space<vmem>>, vector<1x2x128xf32>
    %20 = vector.shape_cast %19 : vector<1x2x128xf32> to vector<2x128xf32>
    %21 = arith.addf %20, %13 : vector<2x128xf32>
    %22 = arith.negf %21 : vector<2x128xf32>
    %23 = math.exp %22 : vector<2x128xf32>
    %cst_23 = arith.constant 1.000000e+00 : f32
    %24 = vector.broadcast %cst_23 : f32 to vector<2x128xf32>
    %25 = arith.addf %24, %23 : vector<2x128xf32>
    %26 = arith.divf %24, %25 : vector<2x128xf32>
    %27 = vector.extract_strided_slice %26 {offsets = [0, 0], sizes = [2, 16], strides = [1, 1]} : vector<2x128xf32> to vector<2x16xf32>
    %28 = vector.extract_strided_slice %26 {offsets = [0, 16], sizes = [2, 16], strides = [1, 1]} : vector<2x128xf32> to vector<2x16xf32>
    %29 = vector.extract_strided_slice %26 {offsets = [0, 32], sizes = [2, 16], strides = [1, 1]} : vector<2x128xf32> to vector<2x16xf32>
    %cst_24 = arith.constant 2.000000e+00 : f32
    %30 = vector.broadcast %cst_24 : f32 to vector<2x16xf32>
    %31 = arith.mulf %30, %29 : vector<2x16xf32>
    %cst_25 = arith.constant 1.000000e+00 : f32
    %32 = vector.broadcast %cst_25 : f32 to vector<2x16xf32>
    %33 = arith.subf %31, %32 : vector<2x16xf32>
    %34 = vector.extract_strided_slice %26 {offsets = [0, 48], sizes = [2, 16], strides = [1, 1]} : vector<2x128xf32> to vector<2x16xf32>
    %35 = arith.mulf %28, %14 : vector<2x16xf32>
    %36 = arith.mulf %27, %33 : vector<2x16xf32>
    %37 = arith.addf %35, %36 : vector<2x16xf32>
    %38 = math.tanh %37 : vector<2x16xf32>
    %39 = arith.mulf %34, %38 : vector<2x16xf32>
    %cst_26 = arith.constant dense<0.000000e+00> : vector<2x128xf32>
    %40 = tpu.matmul %39, %9, %cst_26 {dimension_numbers = #tpu.dot_dimension_numbers<[1], [0], [0], [1], [0, 0, 1, 1], [], []>} : vector<2x16xf32>, vector<16x128xf32>, vector<2x128xf32> -> vector<2x128xf32>
    %41 = vector.broadcast %15 : vector<2x1xf32> to vector<2x128xf32>
    %42 = vector.broadcast %10 : vector<1x128xf32> to vector<2x128xf32>
    %43 = arith.mulf %41, %42 : vector<2x128xf32>
    %44 = arith.addf %40, %43 : vector<2x128xf32>
    %45 = vector.broadcast %11 : vector<1x128xf32> to vector<2x128xf32>
    %46 = arith.addf %44, %45 : vector<2x128xf32>
    %47 = arith.negf %46 : vector<2x128xf32>
    %48 = math.exp %47 : vector<2x128xf32>
    %cst_27 = arith.constant 1.000000e+00 : f32
    %49 = vector.broadcast %cst_27 : f32 to vector<2x128xf32>
    %50 = arith.addf %49, %48 : vector<2x128xf32>
    %51 = arith.divf %49, %50 : vector<2x128xf32>
    %52 = vector.extract_strided_slice %51 {offsets = [0, 64], sizes = [2, 1], strides = [1, 1]} : vector<2x128xf32> to vector<2x1xf32>
    %53 = vector.extract_strided_slice %51 {offsets = [0, 65], sizes = [2, 1], strides = [1, 1]} : vector<2x128xf32> to vector<2x1xf32>
    %54 = vector.extract_strided_slice %51 {offsets = [0, 66], sizes = [2, 1], strides = [1, 1]} : vector<2x128xf32> to vector<2x1xf32>
    %cst_28 = arith.constant 2.000000e+00 : f32
    %55 = vector.broadcast %cst_28 : f32 to vector<2x1xf32>
    %56 = arith.mulf %55, %54 : vector<2x1xf32>
    %cst_29 = arith.constant 1.000000e+00 : f32
    %57 = vector.broadcast %cst_29 : f32 to vector<2x1xf32>
    %58 = arith.subf %56, %57 : vector<2x1xf32>
    %59 = vector.extract_strided_slice %51 {offsets = [0, 67], sizes = [2, 1], strides = [1, 1]} : vector<2x128xf32> to vector<2x1xf32>
    %60 = arith.mulf %53, %16 : vector<2x1xf32>
    %61 = arith.mulf %52, %58 : vector<2x1xf32>
    %62 = arith.addf %60, %61 : vector<2x1xf32>
    %63 = math.tanh %62 : vector<2x1xf32>
    %64 = arith.mulf %59, %63 : vector<2x1xf32>
    %65 = vector.broadcast %c0_i32 : i32 to vector<2x8xi32>
    %66 = arith.cmpi eq, %12, %65 : vector<2x8xi32>
    %67 = vector.shape_cast %64 : vector<2x1xf32> to vector<2x1xf32>
    %68 = vector.broadcast %67 : vector<2x1xf32> to vector<2x8xf32>
    %69 = arith.select %66, %68, %17 : vector<2x8xi1>, vector<2x8xf32>
    %c1_i32 = arith.constant 1 : i32
    %70 = arith.index_cast %c1_i32 : i32 to index
    %c0_30 = arith.constant 0 : index
    %c0_31 = arith.constant 0 : index
    %71 = vector.load %arg7[%70, %c0_30, %c0_31] : memref<8x2x128xf32, #tpu.memory_space<vmem>>, vector<1x2x128xf32>
    %72 = vector.shape_cast %71 : vector<1x2x128xf32> to vector<2x128xf32>
    %73 = arith.addf %72, %40 : vector<2x128xf32>
    %74 = arith.negf %73 : vector<2x128xf32>
    %75 = math.exp %74 : vector<2x128xf32>
    %cst_32 = arith.constant 1.000000e+00 : f32
    %76 = vector.broadcast %cst_32 : f32 to vector<2x128xf32>
    %77 = arith.addf %76, %75 : vector<2x128xf32>
    %78 = arith.divf %76, %77 : vector<2x128xf32>
    %79 = vector.extract_strided_slice %78 {offsets = [0, 0], sizes = [2, 16], strides = [1, 1]} : vector<2x128xf32> to vector<2x16xf32>
    %80 = vector.extract_strided_slice %78 {offsets = [0, 16], sizes = [2, 16], strides = [1, 1]} : vector<2x128xf32> to vector<2x16xf32>
    %81 = vector.extract_strided_slice %78 {offsets = [0, 32], sizes = [2, 16], strides = [1, 1]} : vector<2x128xf32> to vector<2x16xf32>
    %cst_33 = arith.constant 2.000000e+00 : f32
    %82 = vector.broadcast %cst_33 : f32 to vector<2x16xf32>
    %83 = arith.mulf %82, %81 : vector<2x16xf32>
    %cst_34 = arith.constant 1.000000e+00 : f32
    %84 = vector.broadcast %cst_34 : f32 to vector<2x16xf32>
    %85 = arith.subf %83, %84 : vector<2x16xf32>
    %86 = vector.extract_strided_slice %78 {offsets = [0, 48], sizes = [2, 16], strides = [1, 1]} : vector<2x128xf32> to vector<2x16xf32>
    %87 = arith.mulf %80, %37 : vector<2x16xf32>
    %88 = arith.mulf %79, %85 : vector<2x16xf32>
    %89 = arith.addf %87, %88 : vector<2x16xf32>
    %90 = math.tanh %89 : vector<2x16xf32>
    %91 = arith.mulf %86, %90 : vector<2x16xf32>
    %cst_35 = arith.constant dense<0.000000e+00> : vector<2x128xf32>
    %92 = tpu.matmul %91, %9, %cst_35 {dimension_numbers = #tpu.dot_dimension_numbers<[1], [0], [0], [1], [0, 0, 1, 1], [], []>} : vector<2x16xf32>, vector<16x128xf32>, vector<2x128xf32> -> vector<2x128xf32>
    %93 = vector.broadcast %64 : vector<2x1xf32> to vector<2x128xf32>
    %94 = vector.broadcast %10 : vector<1x128xf32> to vector<2x128xf32>
    %95 = arith.mulf %93, %94 : vector<2x128xf32>
    %96 = arith.addf %92, %95 : vector<2x128xf32>
    %97 = vector.broadcast %11 : vector<1x128xf32> to vector<2x128xf32>
    %98 = arith.addf %96, %97 : vector<2x128xf32>
    %99 = arith.negf %98 : vector<2x128xf32>
    %100 = math.exp %99 : vector<2x128xf32>
    %cst_36 = arith.constant 1.000000e+00 : f32
    %101 = vector.broadcast %cst_36 : f32 to vector<2x128xf32>
    %102 = arith.addf %101, %100 : vector<2x128xf32>
    %103 = arith.divf %101, %102 : vector<2x128xf32>
    %104 = vector.extract_strided_slice %103 {offsets = [0, 64], sizes = [2, 1], strides = [1, 1]} : vector<2x128xf32> to vector<2x1xf32>
    %105 = vector.extract_strided_slice %103 {offsets = [0, 65], sizes = [2, 1], strides = [1, 1]} : vector<2x128xf32> to vector<2x1xf32>
    %106 = vector.extract_strided_slice %103 {offsets = [0, 66], sizes = [2, 1], strides = [1, 1]} : vector<2x128xf32> to vector<2x1xf32>
    %cst_37 = arith.constant 2.000000e+00 : f32
    %107 = vector.broadcast %cst_37 : f32 to vector<2x1xf32>
    %108 = arith.mulf %107, %106 : vector<2x1xf32>
    %cst_38 = arith.constant 1.000000e+00 : f32
    %109 = vector.broadcast %cst_38 : f32 to vector<2x1xf32>
    %110 = arith.subf %108, %109 : vector<2x1xf32>
    %111 = vector.extract_strided_slice %103 {offsets = [0, 67], sizes = [2, 1], strides = [1, 1]} : vector<2x128xf32> to vector<2x1xf32>
    %112 = arith.mulf %105, %62 : vector<2x1xf32>
    %113 = arith.mulf %104, %110 : vector<2x1xf32>
    %114 = arith.addf %112, %113 : vector<2x1xf32>
    %115 = math.tanh %114 : vector<2x1xf32>
    %116 = arith.mulf %111, %115 : vector<2x1xf32>
    %117 = vector.broadcast %c1_i32 : i32 to vector<2x8xi32>
    %118 = arith.cmpi eq, %12, %117 : vector<2x8xi32>
    %119 = vector.shape_cast %116 : vector<2x1xf32> to vector<2x1xf32>
    %120 = vector.broadcast %119 : vector<2x1xf32> to vector<2x8xf32>
    %121 = arith.select %118, %120, %69 : vector<2x8xi1>, vector<2x8xf32>
    %c2_i32 = arith.constant 2 : i32
    %122 = arith.index_cast %c2_i32 : i32 to index
    %c0_39 = arith.constant 0 : index
    %c0_40 = arith.constant 0 : index
    %123 = vector.load %arg7[%122, %c0_39, %c0_40] : memref<8x2x128xf32, #tpu.memory_space<vmem>>, vector<1x2x128xf32>
    %124 = vector.shape_cast %123 : vector<1x2x128xf32> to vector<2x128xf32>
    %125 = arith.addf %124, %92 : vector<2x128xf32>
    %126 = arith.negf %125 : vector<2x128xf32>
    %127 = math.exp %126 : vector<2x128xf32>
    %cst_41 = arith.constant 1.000000e+00 : f32
    %128 = vector.broadcast %cst_41 : f32 to vector<2x128xf32>
    %129 = arith.addf %128, %127 : vector<2x128xf32>
    %130 = arith.divf %128, %129 : vector<2x128xf32>
    %131 = vector.extract_strided_slice %130 {offsets = [0, 0], sizes = [2, 16], strides = [1, 1]} : vector<2x128xf32> to vector<2x16xf32>
    %132 = vector.extract_strided_slice %130 {offsets = [0, 16], sizes = [2, 16], strides = [1, 1]} : vector<2x128xf32> to vector<2x16xf32>
    %133 = vector.extract_strided_slice %130 {offsets = [0, 32], sizes = [2, 16], strides = [1, 1]} : vector<2x128xf32> to vector<2x16xf32>
    %cst_42 = arith.constant 2.000000e+00 : f32
    %134 = vector.broadcast %cst_42 : f32 to vector<2x16xf32>
    %135 = arith.mulf %134, %133 : vector<2x16xf32>
    %cst_43 = arith.constant 1.000000e+00 : f32
    %136 = vector.broadcast %cst_43 : f32 to vector<2x16xf32>
    %137 = arith.subf %135, %136 : vector<2x16xf32>
    %138 = vector.extract_strided_slice %130 {offsets = [0, 48], sizes = [2, 16], strides = [1, 1]} : vector<2x128xf32> to vector<2x16xf32>
    %139 = arith.mulf %132, %89 : vector<2x16xf32>
    %140 = arith.mulf %131, %137 : vector<2x16xf32>
    %141 = arith.addf %139, %140 : vector<2x16xf32>
    %142 = math.tanh %141 : vector<2x16xf32>
    %143 = arith.mulf %138, %142 : vector<2x16xf32>
    %cst_44 = arith.constant dense<0.000000e+00> : vector<2x128xf32>
    %144 = tpu.matmul %143, %9, %cst_44 {dimension_numbers = #tpu.dot_dimension_numbers<[1], [0], [0], [1], [0, 0, 1, 1], [], []>} : vector<2x16xf32>, vector<16x128xf32>, vector<2x128xf32> -> vector<2x128xf32>
    %145 = vector.broadcast %116 : vector<2x1xf32> to vector<2x128xf32>
    %146 = vector.broadcast %10 : vector<1x128xf32> to vector<2x128xf32>
    %147 = arith.mulf %145, %146 : vector<2x128xf32>
    %148 = arith.addf %144, %147 : vector<2x128xf32>
    %149 = vector.broadcast %11 : vector<1x128xf32> to vector<2x128xf32>
    %150 = arith.addf %148, %149 : vector<2x128xf32>
    %151 = arith.negf %150 : vector<2x128xf32>
    %152 = math.exp %151 : vector<2x128xf32>
    %cst_45 = arith.constant 1.000000e+00 : f32
    %153 = vector.broadcast %cst_45 : f32 to vector<2x128xf32>
    %154 = arith.addf %153, %152 : vector<2x128xf32>
    %155 = arith.divf %153, %154 : vector<2x128xf32>
    %156 = vector.extract_strided_slice %155 {offsets = [0, 64], sizes = [2, 1], strides = [1, 1]} : vector<2x128xf32> to vector<2x1xf32>
    %157 = vector.extract_strided_slice %155 {offsets = [0, 65], sizes = [2, 1], strides = [1, 1]} : vector<2x128xf32> to vector<2x1xf32>
    %158 = vector.extract_strided_slice %155 {offsets = [0, 66], sizes = [2, 1], strides = [1, 1]} : vector<2x128xf32> to vector<2x1xf32>
    %cst_46 = arith.constant 2.000000e+00 : f32
    %159 = vector.broadcast %cst_46 : f32 to vector<2x1xf32>
    %160 = arith.mulf %159, %158 : vector<2x1xf32>
    %cst_47 = arith.constant 1.000000e+00 : f32
    %161 = vector.broadcast %cst_47 : f32 to vector<2x1xf32>
    %162 = arith.subf %160, %161 : vector<2x1xf32>
    %163 = vector.extract_strided_slice %155 {offsets = [0, 67], sizes = [2, 1], strides = [1, 1]} : vector<2x128xf32> to vector<2x1xf32>
    %164 = arith.mulf %157, %114 : vector<2x1xf32>
    %165 = arith.mulf %156, %162 : vector<2x1xf32>
    %166 = arith.addf %164, %165 : vector<2x1xf32>
    %167 = math.tanh %166 : vector<2x1xf32>
    %168 = arith.mulf %163, %167 : vector<2x1xf32>
    %169 = vector.broadcast %c2_i32 : i32 to vector<2x8xi32>
    %170 = arith.cmpi eq, %12, %169 : vector<2x8xi32>
    %171 = vector.shape_cast %168 : vector<2x1xf32> to vector<2x1xf32>
    %172 = vector.broadcast %171 : vector<2x1xf32> to vector<2x8xf32>
    %173 = arith.select %170, %172, %121 : vector<2x8xi1>, vector<2x8xf32>
    %c3_i32 = arith.constant 3 : i32
    %174 = arith.index_cast %c3_i32 : i32 to index
    %c0_48 = arith.constant 0 : index
    %c0_49 = arith.constant 0 : index
    %175 = vector.load %arg7[%174, %c0_48, %c0_49] : memref<8x2x128xf32, #tpu.memory_space<vmem>>, vector<1x2x128xf32>
    %176 = vector.shape_cast %175 : vector<1x2x128xf32> to vector<2x128xf32>
    %177 = arith.addf %176, %144 : vector<2x128xf32>
    %178 = arith.negf %177 : vector<2x128xf32>
    %179 = math.exp %178 : vector<2x128xf32>
    %cst_50 = arith.constant 1.000000e+00 : f32
    %180 = vector.broadcast %cst_50 : f32 to vector<2x128xf32>
    %181 = arith.addf %180, %179 : vector<2x128xf32>
    %182 = arith.divf %180, %181 : vector<2x128xf32>
    %183 = vector.extract_strided_slice %182 {offsets = [0, 0], sizes = [2, 16], strides = [1, 1]} : vector<2x128xf32> to vector<2x16xf32>
    %184 = vector.extract_strided_slice %182 {offsets = [0, 16], sizes = [2, 16], strides = [1, 1]} : vector<2x128xf32> to vector<2x16xf32>
    %185 = vector.extract_strided_slice %182 {offsets = [0, 32], sizes = [2, 16], strides = [1, 1]} : vector<2x128xf32> to vector<2x16xf32>
    %cst_51 = arith.constant 2.000000e+00 : f32
    %186 = vector.broadcast %cst_51 : f32 to vector<2x16xf32>
    %187 = arith.mulf %186, %185 : vector<2x16xf32>
    %cst_52 = arith.constant 1.000000e+00 : f32
    %188 = vector.broadcast %cst_52 : f32 to vector<2x16xf32>
    %189 = arith.subf %187, %188 : vector<2x16xf32>
    %190 = vector.extract_strided_slice %182 {offsets = [0, 48], sizes = [2, 16], strides = [1, 1]} : vector<2x128xf32> to vector<2x16xf32>
    %191 = arith.mulf %184, %141 : vector<2x16xf32>
    %192 = arith.mulf %183, %189 : vector<2x16xf32>
    %193 = arith.addf %191, %192 : vector<2x16xf32>
    %194 = math.tanh %193 : vector<2x16xf32>
    %195 = arith.mulf %190, %194 : vector<2x16xf32>
    %cst_53 = arith.constant dense<0.000000e+00> : vector<2x128xf32>
    %196 = tpu.matmul %195, %9, %cst_53 {dimension_numbers = #tpu.dot_dimension_numbers<[1], [0], [0], [1], [0, 0, 1, 1], [], []>} : vector<2x16xf32>, vector<16x128xf32>, vector<2x128xf32> -> vector<2x128xf32>
    %197 = vector.broadcast %168 : vector<2x1xf32> to vector<2x128xf32>
    %198 = vector.broadcast %10 : vector<1x128xf32> to vector<2x128xf32>
    %199 = arith.mulf %197, %198 : vector<2x128xf32>
    %200 = arith.addf %196, %199 : vector<2x128xf32>
    %201 = vector.broadcast %11 : vector<1x128xf32> to vector<2x128xf32>
    %202 = arith.addf %200, %201 : vector<2x128xf32>
    %203 = arith.negf %202 : vector<2x128xf32>
    %204 = math.exp %203 : vector<2x128xf32>
    %cst_54 = arith.constant 1.000000e+00 : f32
    %205 = vector.broadcast %cst_54 : f32 to vector<2x128xf32>
    %206 = arith.addf %205, %204 : vector<2x128xf32>
    %207 = arith.divf %205, %206 : vector<2x128xf32>
    %208 = vector.extract_strided_slice %207 {offsets = [0, 64], sizes = [2, 1], strides = [1, 1]} : vector<2x128xf32> to vector<2x1xf32>
    %209 = vector.extract_strided_slice %207 {offsets = [0, 65], sizes = [2, 1], strides = [1, 1]} : vector<2x128xf32> to vector<2x1xf32>
    %210 = vector.extract_strided_slice %207 {offsets = [0, 66], sizes = [2, 1], strides = [1, 1]} : vector<2x128xf32> to vector<2x1xf32>
    %cst_55 = arith.constant 2.000000e+00 : f32
    %211 = vector.broadcast %cst_55 : f32 to vector<2x1xf32>
    %212 = arith.mulf %211, %210 : vector<2x1xf32>
    %cst_56 = arith.constant 1.000000e+00 : f32
    %213 = vector.broadcast %cst_56 : f32 to vector<2x1xf32>
    %214 = arith.subf %212, %213 : vector<2x1xf32>
    %215 = vector.extract_strided_slice %207 {offsets = [0, 67], sizes = [2, 1], strides = [1, 1]} : vector<2x128xf32> to vector<2x1xf32>
    %216 = arith.mulf %209, %166 : vector<2x1xf32>
    %217 = arith.mulf %208, %214 : vector<2x1xf32>
    %218 = arith.addf %216, %217 : vector<2x1xf32>
    %219 = math.tanh %218 : vector<2x1xf32>
    %220 = arith.mulf %215, %219 : vector<2x1xf32>
    %221 = vector.broadcast %c3_i32 : i32 to vector<2x8xi32>
    %222 = arith.cmpi eq, %12, %221 : vector<2x8xi32>
    %223 = vector.shape_cast %220 : vector<2x1xf32> to vector<2x1xf32>
    %224 = vector.broadcast %223 : vector<2x1xf32> to vector<2x8xf32>
    %225 = arith.select %222, %224, %173 : vector<2x8xi1>, vector<2x8xf32>
    %c4_i32 = arith.constant 4 : i32
    %226 = arith.index_cast %c4_i32 : i32 to index
    %c0_57 = arith.constant 0 : index
    %c0_58 = arith.constant 0 : index
    %227 = vector.load %arg7[%226, %c0_57, %c0_58] : memref<8x2x128xf32, #tpu.memory_space<vmem>>, vector<1x2x128xf32>
    %228 = vector.shape_cast %227 : vector<1x2x128xf32> to vector<2x128xf32>
    %229 = arith.addf %228, %196 : vector<2x128xf32>
    %230 = arith.negf %229 : vector<2x128xf32>
    %231 = math.exp %230 : vector<2x128xf32>
    %cst_59 = arith.constant 1.000000e+00 : f32
    %232 = vector.broadcast %cst_59 : f32 to vector<2x128xf32>
    %233 = arith.addf %232, %231 : vector<2x128xf32>
    %234 = arith.divf %232, %233 : vector<2x128xf32>
    %235 = vector.extract_strided_slice %234 {offsets = [0, 0], sizes = [2, 16], strides = [1, 1]} : vector<2x128xf32> to vector<2x16xf32>
    %236 = vector.extract_strided_slice %234 {offsets = [0, 16], sizes = [2, 16], strides = [1, 1]} : vector<2x128xf32> to vector<2x16xf32>
    %237 = vector.extract_strided_slice %234 {offsets = [0, 32], sizes = [2, 16], strides = [1, 1]} : vector<2x128xf32> to vector<2x16xf32>
    %cst_60 = arith.constant 2.000000e+00 : f32
    %238 = vector.broadcast %cst_60 : f32 to vector<2x16xf32>
    %239 = arith.mulf %238, %237 : vector<2x16xf32>
    %cst_61 = arith.constant 1.000000e+00 : f32
    %240 = vector.broadcast %cst_61 : f32 to vector<2x16xf32>
    %241 = arith.subf %239, %240 : vector<2x16xf32>
    %242 = vector.extract_strided_slice %234 {offsets = [0, 48], sizes = [2, 16], strides = [1, 1]} : vector<2x128xf32> to vector<2x16xf32>
    %243 = arith.mulf %236, %193 : vector<2x16xf32>
    %244 = arith.mulf %235, %241 : vector<2x16xf32>
    %245 = arith.addf %243, %244 : vector<2x16xf32>
    %246 = math.tanh %245 : vector<2x16xf32>
    %247 = arith.mulf %242, %246 : vector<2x16xf32>
    %cst_62 = arith.constant dense<0.000000e+00> : vector<2x128xf32>
    %248 = tpu.matmul %247, %9, %cst_62 {dimension_numbers = #tpu.dot_dimension_numbers<[1], [0], [0], [1], [0, 0, 1, 1], [], []>} : vector<2x16xf32>, vector<16x128xf32>, vector<2x128xf32> -> vector<2x128xf32>
    %249 = vector.broadcast %220 : vector<2x1xf32> to vector<2x128xf32>
    %250 = vector.broadcast %10 : vector<1x128xf32> to vector<2x128xf32>
    %251 = arith.mulf %249, %250 : vector<2x128xf32>
    %252 = arith.addf %248, %251 : vector<2x128xf32>
    %253 = vector.broadcast %11 : vector<1x128xf32> to vector<2x128xf32>
    %254 = arith.addf %252, %253 : vector<2x128xf32>
    %255 = arith.negf %254 : vector<2x128xf32>
    %256 = math.exp %255 : vector<2x128xf32>
    %cst_63 = arith.constant 1.000000e+00 : f32
    %257 = vector.broadcast %cst_63 : f32 to vector<2x128xf32>
    %258 = arith.addf %257, %256 : vector<2x128xf32>
    %259 = arith.divf %257, %258 : vector<2x128xf32>
    %260 = vector.extract_strided_slice %259 {offsets = [0, 64], sizes = [2, 1], strides = [1, 1]} : vector<2x128xf32> to vector<2x1xf32>
    %261 = vector.extract_strided_slice %259 {offsets = [0, 65], sizes = [2, 1], strides = [1, 1]} : vector<2x128xf32> to vector<2x1xf32>
    %262 = vector.extract_strided_slice %259 {offsets = [0, 66], sizes = [2, 1], strides = [1, 1]} : vector<2x128xf32> to vector<2x1xf32>
    %cst_64 = arith.constant 2.000000e+00 : f32
    %263 = vector.broadcast %cst_64 : f32 to vector<2x1xf32>
    %264 = arith.mulf %263, %262 : vector<2x1xf32>
    %cst_65 = arith.constant 1.000000e+00 : f32
    %265 = vector.broadcast %cst_65 : f32 to vector<2x1xf32>
    %266 = arith.subf %264, %265 : vector<2x1xf32>
    %267 = vector.extract_strided_slice %259 {offsets = [0, 67], sizes = [2, 1], strides = [1, 1]} : vector<2x128xf32> to vector<2x1xf32>
    %268 = arith.mulf %261, %218 : vector<2x1xf32>
    %269 = arith.mulf %260, %266 : vector<2x1xf32>
    %270 = arith.addf %268, %269 : vector<2x1xf32>
    %271 = math.tanh %270 : vector<2x1xf32>
    %272 = arith.mulf %267, %271 : vector<2x1xf32>
    %273 = vector.broadcast %c4_i32 : i32 to vector<2x8xi32>
    %274 = arith.cmpi eq, %12, %273 : vector<2x8xi32>
    %275 = vector.shape_cast %272 : vector<2x1xf32> to vector<2x1xf32>
    %276 = vector.broadcast %275 : vector<2x1xf32> to vector<2x8xf32>
    %277 = arith.select %274, %276, %225 : vector<2x8xi1>, vector<2x8xf32>
    %c5_i32 = arith.constant 5 : i32
    %278 = arith.index_cast %c5_i32 : i32 to index
    %c0_66 = arith.constant 0 : index
    %c0_67 = arith.constant 0 : index
    %279 = vector.load %arg7[%278, %c0_66, %c0_67] : memref<8x2x128xf32, #tpu.memory_space<vmem>>, vector<1x2x128xf32>
    %280 = vector.shape_cast %279 : vector<1x2x128xf32> to vector<2x128xf32>
    %281 = arith.addf %280, %248 : vector<2x128xf32>
    %282 = arith.negf %281 : vector<2x128xf32>
    %283 = math.exp %282 : vector<2x128xf32>
    %cst_68 = arith.constant 1.000000e+00 : f32
    %284 = vector.broadcast %cst_68 : f32 to vector<2x128xf32>
    %285 = arith.addf %284, %283 : vector<2x128xf32>
    %286 = arith.divf %284, %285 : vector<2x128xf32>
    %287 = vector.extract_strided_slice %286 {offsets = [0, 0], sizes = [2, 16], strides = [1, 1]} : vector<2x128xf32> to vector<2x16xf32>
    %288 = vector.extract_strided_slice %286 {offsets = [0, 16], sizes = [2, 16], strides = [1, 1]} : vector<2x128xf32> to vector<2x16xf32>
    %289 = vector.extract_strided_slice %286 {offsets = [0, 32], sizes = [2, 16], strides = [1, 1]} : vector<2x128xf32> to vector<2x16xf32>
    %cst_69 = arith.constant 2.000000e+00 : f32
    %290 = vector.broadcast %cst_69 : f32 to vector<2x16xf32>
    %291 = arith.mulf %290, %289 : vector<2x16xf32>
    %cst_70 = arith.constant 1.000000e+00 : f32
    %292 = vector.broadcast %cst_70 : f32 to vector<2x16xf32>
    %293 = arith.subf %291, %292 : vector<2x16xf32>
    %294 = vector.extract_strided_slice %286 {offsets = [0, 48], sizes = [2, 16], strides = [1, 1]} : vector<2x128xf32> to vector<2x16xf32>
    %295 = arith.mulf %288, %245 : vector<2x16xf32>
    %296 = arith.mulf %287, %293 : vector<2x16xf32>
    %297 = arith.addf %295, %296 : vector<2x16xf32>
    %298 = math.tanh %297 : vector<2x16xf32>
    %299 = arith.mulf %294, %298 : vector<2x16xf32>
    %cst_71 = arith.constant dense<0.000000e+00> : vector<2x128xf32>
    %300 = tpu.matmul %299, %9, %cst_71 {dimension_numbers = #tpu.dot_dimension_numbers<[1], [0], [0], [1], [0, 0, 1, 1], [], []>} : vector<2x16xf32>, vector<16x128xf32>, vector<2x128xf32> -> vector<2x128xf32>
    %301 = vector.broadcast %272 : vector<2x1xf32> to vector<2x128xf32>
    %302 = vector.broadcast %10 : vector<1x128xf32> to vector<2x128xf32>
    %303 = arith.mulf %301, %302 : vector<2x128xf32>
    %304 = arith.addf %300, %303 : vector<2x128xf32>
    %305 = vector.broadcast %11 : vector<1x128xf32> to vector<2x128xf32>
    %306 = arith.addf %304, %305 : vector<2x128xf32>
    %307 = arith.negf %306 : vector<2x128xf32>
    %308 = math.exp %307 : vector<2x128xf32>
    %cst_72 = arith.constant 1.000000e+00 : f32
    %309 = vector.broadcast %cst_72 : f32 to vector<2x128xf32>
    %310 = arith.addf %309, %308 : vector<2x128xf32>
    %311 = arith.divf %309, %310 : vector<2x128xf32>
    %312 = vector.extract_strided_slice %311 {offsets = [0, 64], sizes = [2, 1], strides = [1, 1]} : vector<2x128xf32> to vector<2x1xf32>
    %313 = vector.extract_strided_slice %311 {offsets = [0, 65], sizes = [2, 1], strides = [1, 1]} : vector<2x128xf32> to vector<2x1xf32>
    %314 = vector.extract_strided_slice %311 {offsets = [0, 66], sizes = [2, 1], strides = [1, 1]} : vector<2x128xf32> to vector<2x1xf32>
    %cst_73 = arith.constant 2.000000e+00 : f32
    %315 = vector.broadcast %cst_73 : f32 to vector<2x1xf32>
    %316 = arith.mulf %315, %314 : vector<2x1xf32>
    %cst_74 = arith.constant 1.000000e+00 : f32
    %317 = vector.broadcast %cst_74 : f32 to vector<2x1xf32>
    %318 = arith.subf %316, %317 : vector<2x1xf32>
    %319 = vector.extract_strided_slice %311 {offsets = [0, 67], sizes = [2, 1], strides = [1, 1]} : vector<2x128xf32> to vector<2x1xf32>
    %320 = arith.mulf %313, %270 : vector<2x1xf32>
    %321 = arith.mulf %312, %318 : vector<2x1xf32>
    %322 = arith.addf %320, %321 : vector<2x1xf32>
    %323 = math.tanh %322 : vector<2x1xf32>
    %324 = arith.mulf %319, %323 : vector<2x1xf32>
    %325 = vector.broadcast %c5_i32 : i32 to vector<2x8xi32>
    %326 = arith.cmpi eq, %12, %325 : vector<2x8xi32>
    %327 = vector.shape_cast %324 : vector<2x1xf32> to vector<2x1xf32>
    %328 = vector.broadcast %327 : vector<2x1xf32> to vector<2x8xf32>
    %329 = arith.select %326, %328, %277 : vector<2x8xi1>, vector<2x8xf32>
    %c6_i32 = arith.constant 6 : i32
    %330 = arith.index_cast %c6_i32 : i32 to index
    %c0_75 = arith.constant 0 : index
    %c0_76 = arith.constant 0 : index
    %331 = vector.load %arg7[%330, %c0_75, %c0_76] : memref<8x2x128xf32, #tpu.memory_space<vmem>>, vector<1x2x128xf32>
    %332 = vector.shape_cast %331 : vector<1x2x128xf32> to vector<2x128xf32>
    %333 = arith.addf %332, %300 : vector<2x128xf32>
    %334 = arith.negf %333 : vector<2x128xf32>
    %335 = math.exp %334 : vector<2x128xf32>
    %cst_77 = arith.constant 1.000000e+00 : f32
    %336 = vector.broadcast %cst_77 : f32 to vector<2x128xf32>
    %337 = arith.addf %336, %335 : vector<2x128xf32>
    %338 = arith.divf %336, %337 : vector<2x128xf32>
    %339 = vector.extract_strided_slice %338 {offsets = [0, 0], sizes = [2, 16], strides = [1, 1]} : vector<2x128xf32> to vector<2x16xf32>
    %340 = vector.extract_strided_slice %338 {offsets = [0, 16], sizes = [2, 16], strides = [1, 1]} : vector<2x128xf32> to vector<2x16xf32>
    %341 = vector.extract_strided_slice %338 {offsets = [0, 32], sizes = [2, 16], strides = [1, 1]} : vector<2x128xf32> to vector<2x16xf32>
    %cst_78 = arith.constant 2.000000e+00 : f32
    %342 = vector.broadcast %cst_78 : f32 to vector<2x16xf32>
    %343 = arith.mulf %342, %341 : vector<2x16xf32>
    %cst_79 = arith.constant 1.000000e+00 : f32
    %344 = vector.broadcast %cst_79 : f32 to vector<2x16xf32>
    %345 = arith.subf %343, %344 : vector<2x16xf32>
    %346 = vector.extract_strided_slice %338 {offsets = [0, 48], sizes = [2, 16], strides = [1, 1]} : vector<2x128xf32> to vector<2x16xf32>
    %347 = arith.mulf %340, %297 : vector<2x16xf32>
    %348 = arith.mulf %339, %345 : vector<2x16xf32>
    %349 = arith.addf %347, %348 : vector<2x16xf32>
    %350 = math.tanh %349 : vector<2x16xf32>
    %351 = arith.mulf %346, %350 : vector<2x16xf32>
    %cst_80 = arith.constant dense<0.000000e+00> : vector<2x128xf32>
    %352 = tpu.matmul %351, %9, %cst_80 {dimension_numbers = #tpu.dot_dimension_numbers<[1], [0], [0], [1], [0, 0, 1, 1], [], []>} : vector<2x16xf32>, vector<16x128xf32>, vector<2x128xf32> -> vector<2x128xf32>
    %353 = vector.broadcast %324 : vector<2x1xf32> to vector<2x128xf32>
    %354 = vector.broadcast %10 : vector<1x128xf32> to vector<2x128xf32>
    %355 = arith.mulf %353, %354 : vector<2x128xf32>
    %356 = arith.addf %352, %355 : vector<2x128xf32>
    %357 = vector.broadcast %11 : vector<1x128xf32> to vector<2x128xf32>
    %358 = arith.addf %356, %357 : vector<2x128xf32>
    %359 = arith.negf %358 : vector<2x128xf32>
    %360 = math.exp %359 : vector<2x128xf32>
    %cst_81 = arith.constant 1.000000e+00 : f32
    %361 = vector.broadcast %cst_81 : f32 to vector<2x128xf32>
    %362 = arith.addf %361, %360 : vector<2x128xf32>
    %363 = arith.divf %361, %362 : vector<2x128xf32>
    %364 = vector.extract_strided_slice %363 {offsets = [0, 64], sizes = [2, 1], strides = [1, 1]} : vector<2x128xf32> to vector<2x1xf32>
    %365 = vector.extract_strided_slice %363 {offsets = [0, 65], sizes = [2, 1], strides = [1, 1]} : vector<2x128xf32> to vector<2x1xf32>
    %366 = vector.extract_strided_slice %363 {offsets = [0, 66], sizes = [2, 1], strides = [1, 1]} : vector<2x128xf32> to vector<2x1xf32>
    %cst_82 = arith.constant 2.000000e+00 : f32
    %367 = vector.broadcast %cst_82 : f32 to vector<2x1xf32>
    %368 = arith.mulf %367, %366 : vector<2x1xf32>
    %cst_83 = arith.constant 1.000000e+00 : f32
    %369 = vector.broadcast %cst_83 : f32 to vector<2x1xf32>
    %370 = arith.subf %368, %369 : vector<2x1xf32>
    %371 = vector.extract_strided_slice %363 {offsets = [0, 67], sizes = [2, 1], strides = [1, 1]} : vector<2x128xf32> to vector<2x1xf32>
    %372 = arith.mulf %365, %322 : vector<2x1xf32>
    %373 = arith.mulf %364, %370 : vector<2x1xf32>
    %374 = arith.addf %372, %373 : vector<2x1xf32>
    %375 = math.tanh %374 : vector<2x1xf32>
    %376 = arith.mulf %371, %375 : vector<2x1xf32>
    %377 = vector.broadcast %c6_i32 : i32 to vector<2x8xi32>
    %378 = arith.cmpi eq, %12, %377 : vector<2x8xi32>
    %379 = vector.shape_cast %376 : vector<2x1xf32> to vector<2x1xf32>
    %380 = vector.broadcast %379 : vector<2x1xf32> to vector<2x8xf32>
    %381 = arith.select %378, %380, %329 : vector<2x8xi1>, vector<2x8xf32>
    %c7_i32 = arith.constant 7 : i32
    %382 = arith.index_cast %c7_i32 : i32 to index
    %c0_84 = arith.constant 0 : index
    %c0_85 = arith.constant 0 : index
    %383 = vector.load %arg7[%382, %c0_84, %c0_85] : memref<8x2x128xf32, #tpu.memory_space<vmem>>, vector<1x2x128xf32>
    %384 = vector.shape_cast %383 : vector<1x2x128xf32> to vector<2x128xf32>
    %385 = arith.addf %384, %352 : vector<2x128xf32>
    %386 = arith.negf %385 : vector<2x128xf32>
    %387 = math.exp %386 : vector<2x128xf32>
    %cst_86 = arith.constant 1.000000e+00 : f32
    %388 = vector.broadcast %cst_86 : f32 to vector<2x128xf32>
    %389 = arith.addf %388, %387 : vector<2x128xf32>
    %390 = arith.divf %388, %389 : vector<2x128xf32>
    %391 = vector.extract_strided_slice %390 {offsets = [0, 0], sizes = [2, 16], strides = [1, 1]} : vector<2x128xf32> to vector<2x16xf32>
    %392 = vector.extract_strided_slice %390 {offsets = [0, 16], sizes = [2, 16], strides = [1, 1]} : vector<2x128xf32> to vector<2x16xf32>
    %393 = vector.extract_strided_slice %390 {offsets = [0, 32], sizes = [2, 16], strides = [1, 1]} : vector<2x128xf32> to vector<2x16xf32>
    %cst_87 = arith.constant 2.000000e+00 : f32
    %394 = vector.broadcast %cst_87 : f32 to vector<2x16xf32>
    %395 = arith.mulf %394, %393 : vector<2x16xf32>
    %cst_88 = arith.constant 1.000000e+00 : f32
    %396 = vector.broadcast %cst_88 : f32 to vector<2x16xf32>
    %397 = arith.subf %395, %396 : vector<2x16xf32>
    %398 = vector.extract_strided_slice %390 {offsets = [0, 48], sizes = [2, 16], strides = [1, 1]} : vector<2x128xf32> to vector<2x16xf32>
    %399 = arith.mulf %392, %349 : vector<2x16xf32>
    %400 = arith.mulf %391, %397 : vector<2x16xf32>
    %401 = arith.addf %399, %400 : vector<2x16xf32>
    %402 = math.tanh %401 : vector<2x16xf32>
    %403 = arith.mulf %398, %402 : vector<2x16xf32>
    %cst_89 = arith.constant dense<0.000000e+00> : vector<2x128xf32>
    %404 = tpu.matmul %403, %9, %cst_89 {dimension_numbers = #tpu.dot_dimension_numbers<[1], [0], [0], [1], [0, 0, 1, 1], [], []>} : vector<2x16xf32>, vector<16x128xf32>, vector<2x128xf32> -> vector<2x128xf32>
    %405 = vector.broadcast %376 : vector<2x1xf32> to vector<2x128xf32>
    %406 = vector.broadcast %10 : vector<1x128xf32> to vector<2x128xf32>
    %407 = arith.mulf %405, %406 : vector<2x128xf32>
    %408 = arith.addf %404, %407 : vector<2x128xf32>
    %409 = vector.broadcast %11 : vector<1x128xf32> to vector<2x128xf32>
    %410 = arith.addf %408, %409 : vector<2x128xf32>
    %411 = arith.negf %410 : vector<2x128xf32>
    %412 = math.exp %411 : vector<2x128xf32>
    %cst_90 = arith.constant 1.000000e+00 : f32
    %413 = vector.broadcast %cst_90 : f32 to vector<2x128xf32>
    %414 = arith.addf %413, %412 : vector<2x128xf32>
    %415 = arith.divf %413, %414 : vector<2x128xf32>
    %416 = vector.extract_strided_slice %415 {offsets = [0, 64], sizes = [2, 1], strides = [1, 1]} : vector<2x128xf32> to vector<2x1xf32>
    %417 = vector.extract_strided_slice %415 {offsets = [0, 65], sizes = [2, 1], strides = [1, 1]} : vector<2x128xf32> to vector<2x1xf32>
    %418 = vector.extract_strided_slice %415 {offsets = [0, 66], sizes = [2, 1], strides = [1, 1]} : vector<2x128xf32> to vector<2x1xf32>
    %cst_91 = arith.constant 2.000000e+00 : f32
    %419 = vector.broadcast %cst_91 : f32 to vector<2x1xf32>
    %420 = arith.mulf %419, %418 : vector<2x1xf32>
    %cst_92 = arith.constant 1.000000e+00 : f32
    %421 = vector.broadcast %cst_92 : f32 to vector<2x1xf32>
    %422 = arith.subf %420, %421 : vector<2x1xf32>
    %423 = vector.extract_strided_slice %415 {offsets = [0, 67], sizes = [2, 1], strides = [1, 1]} : vector<2x128xf32> to vector<2x1xf32>
    %424 = arith.mulf %417, %374 : vector<2x1xf32>
    %425 = arith.mulf %416, %422 : vector<2x1xf32>
    %426 = arith.addf %424, %425 : vector<2x1xf32>
    %427 = math.tanh %426 : vector<2x1xf32>
    %428 = arith.mulf %423, %427 : vector<2x1xf32>
    %429 = vector.broadcast %c7_i32 : i32 to vector<2x8xi32>
    %430 = arith.cmpi eq, %12, %429 : vector<2x8xi32>
    %431 = vector.shape_cast %428 : vector<2x1xf32> to vector<2x1xf32>
    %432 = vector.broadcast %431 : vector<2x1xf32> to vector<2x8xf32>
    %433 = arith.select %430, %432, %381 : vector<2x8xi1>, vector<2x8xf32>
    %c8_i32 = arith.constant 8 : i32
    %c0_93 = arith.constant 0 : index
    %c0_94 = arith.constant 0 : index
    %434 = vector.load %arg6[%c0_93, %c0_94] : memref<2x8xf32, #tpu.memory_space<vmem>>, vector<2x8xf32>
    tpu.vector_store %arg6[%c0_93, %c0_94], %433 {strides = array<i32>} : memref<2x8xf32, #tpu.memory_space<vmem>>, vector<2x8xf32>,
    return
  }
}

</mosaic_0001>

<bundles_post_ra>
// kernel: vd_decoder_forward.1
= control target key start
LH: loop header
LB: loop body
LE: loop exit
PB: predicated region body
PF: predicated region fallthrough
CT: control target
= control target key end

     0   :  { %v1534_v1 = vmov 0   ;;  %s1844_s0 = inlined_call_operand.vmem [shape: f32[8,2,1], index: 0, kind: input, shape index: {}]   ;;  %s1845_s1 = inlined_call_operand.vmem [shape: f32[1,1,128], index: 1, kind: input, shape index: {}]   ;;  %s1846_s2 = inlined_call_operand.vmem [shape: f32[1,1,128], index: 2, kind: input, shape index: {}]   ;;  %s1847_s3 = inlined_call_operand.vmem [shape: f32[16,128], index: 3, kind: input, shape index: {}]   ;;  %s1848_s4 = inlined_call_operand.vmem [shape: f32[1,128], index: 4, kind: input, shape index: {}]   ;;  %s1849_s5 = inlined_call_operand.vmem [shape: f32[1,128], index: 5, kind: input, shape index: {}]   ;;  %s1850_s6 = inlined_call_operand.hbm [shape: f32[2,8], index: 6, kind: output, shape index: {}]  }
   0x1   :  { %v24_v0 = vld [vmem:[%s1844_s0] sm:$0x3]  ;;  %1408 = vset.pattern.permute.xlu0 %v1534_v1  ;;  %1409 = vset.pattern.permute.xlu1 %v1534_v1 }
   0x2   :  { %11 = vsyncpa [#allocation4], 0  ;;  %35 = vperm.xlu0 %1408, %v24_v0   ;;  %v1590_v2 = vld [vmem:[%s1845_s1] ss:$0 sm:$0xff]  ;;  %s1535_s1 = smov 96   ;;  %v111_v20 = vld [vmem:[%s1847_s3 + $0x8] sm:$0xff] }
   0x3   :  { %v1595_v3 = vld [vmem:[%s1846_s2] ss:$0 sm:$0xff]  ;;  %s1536_s2 = smov 16   ;;  %v1537_v21 = vmov 0.0|0.0   ;;  %vm1538_vm0 = vmmov 0   ;;  %v1539_v23 = vmov 0.0  }
   0x4   :  { %v110_v19 = vld [vmem:[%s1847_s3] sm:$0xff]  ;;  %1371 = vmatprep.subr.bf16.mxu0 %v1537_v21  ;;  %1319 = vmatprep.mubr.msk.f32.mxu0 %vm1538_vm0, %v1539_v23  ;;  %s1540_s3 = smov 32   ;;  %s1541_s9 = smov 80   ;;  %vm146_vm1 = vcmask 130048   ;;  %vm1231_vm10 = vcmask 58368  }
   0x5   :  { %v1608_v22 = vpack.c.bf16 %v111_v20, %v110_v19  ;;  %1374 = vmatprep.subr.bf16.mxu1 %v1537_v21  ;;  %1326 = vmatprep.mubr.msk.f32.mxu1 %vm1538_vm0, %v1539_v23  ;;  %v25_v25 = vld [vmem:[%s1844_s0 + $0x2] sm:$0x3]  ;;  %v26_v48 = vld [vmem:[%s1844_s0 + $0x4] sm:$0x3]  ;;  %s1545_s20 = smov 2  }
   0x7   :  { %1373 = vmatpush3.bf16.msra.mxu0 %v1608_v22  ;;  %1376 = vmatpush3.bf16.msra.mxu1 %v1608_v22 }
   0x8   :  { %1377 = vmatprep.subr.bf16.mxu0 %v1537_v21  ;;  %1380 = vmatprep.subr.bf16.mxu1 %v1537_v21 }
  0x81   :  { %v36_v4 = vpop.permute.xlu0 %35 }
  0x82   :  { %v79_v5 = vmul.f32 %v1590_v2, %v36_v4 }
  0x84   :  { %v94_v6 = vadd.f32 %v1595_v3, %v79_v5 }
  0x86   :  { %102 = vst [vmem:[#allocation2] sm:$0x3] %v94_v6 }
  0x8d   :  { %v116_v7 = vld [vmem:[#allocation2] sm:$0x3] }
  0x8e   :  { %v1249_v8 = vmul.f32 -1.442695, %v116_v7 }
  0x90   :  { %1414 = vpow2.f32 %v1249_v8 }
  0x9a   :  { %v1415_v9 = vpop.eup %1414 }
  0x9b   :  { %v121_v10 = vadd.f32 1.0, %v1415_v9 }
  0x9d   :  { %1416 = vrcp.f32 %v121_v10  ;;  %v27_v10 = vld [vmem:[%s1844_s0 + $0x6] sm:$0x3] }
  0xa7   :  { %v1417_v11 = vpop.eup %1416 }
  0xa8   :  { %v124_v12 = vmul.f32 2.0, %v1417_v11  ;;  %v126_v16 = vmul.f32 0.0, %v1417_v11 }
  0xaa   :  { %v1250_v13 = vadd.f32 -1.0, %v124_v12 }
  0xac   :  { %128 = vrot.lane.b32.xlu0 %v1250_v13, %s1535_s1 }
 0x11e   :  { %v129_v14 = vpop.permute.xlu0 %128 }
 0x11f   :  { %v131_v15 = vmul.f32 %v1417_v11, %v129_v14 }
 0x121   :  { %133 = vrot.lane.b32.xlu1 %v131_v15, %s1536_s2 }
 0x193   :  { %v134_v17 = vpop.permute.xlu1 %133 }
 0x194   :  { %v136_v18 = vadd.f32 %v134_v17, %v126_v16 }
 0x196   :  { %1418 = vtanh.f32 %v136_v18 }
 0x1a0   :  { %v1419_v24 = vpop.eup %1418 }
 0x1a1   :  { %139 = vrot.lane.b32.xlu1 %v1419_v24, %s1540_s3 }
 0x1a5   :  { %40 = vperm.xlu1 %1409, %v25_v25  }
 0x213   :  { %v140_v26 = vpop.permute.xlu1 %139 }
 0x214   :  { %v142_v27 = vmul.f32 %v1417_v11, %v140_v26 }
 0x216   :  { %144 = vrot.lane.b32.xlu0 %v142_v27, %s1541_s9 }
 0x224   :  { %v41_v29 = vpop.permute.xlu1 %40 }
 0x225   :  { %v80_v30 = vmul.f32 %v1590_v2, %v41_v29 }
 0x227   :  { %v95_v31 = vadd.f32 %v1595_v3, %v80_v30 }
 0x229   :  { %103 = vst [vmem:[#allocation2 + $0x2] sm:$0x3] %v95_v31 }
 0x230   :  { %v267_v32 = vld [vmem:[#allocation2 + $0x2] sm:$0x3] }
 0x288   :  { %v145_v28 = vpop.permute.xlu0 %144 }
 0x289   :  { %1320 = vmatmul.mubr.msk.f32.vlgmr.msra.gmra.mrb[0].mxu0 %vm146_vm1, %v145_v28 }
 0x28a   :  { %1379 = vmatpush3.bf16.msra.mxu0 %v1608_v22  ;;  %1333 = vmatprep.mubr.msk.f32.mxu0 %vm1538_vm0, %v1539_v23 }
 0x28b   :  { %1383 = vmatprep.subr.bf16.mxu0 %v1537_v21 }
 0x35c   :  { %v1631_v33 = vpop.f32.mrb[0].mxu0 }
 0x35d   :  { %v268_v34 = vadd.f32 %v267_v32, %v1631_v33  ;;  %v1321_v35 = vpop.f32.mrb[1].mxu0 }
 0x35f   :  { %v1256_v36 = vmul.f32 -1.442695, %v268_v34 }
 0x361   :  { %1420 = vpow2.f32 %v1256_v36 }
 0x36b   :  { %v1421_v37 = vpop.eup %1420 }
 0x36c   :  { %v272_v38 = vadd.f32 1.0, %v1421_v37  ;;  %v28_v37 = vld [vmem:[%s1844_s0 + $0x8] sm:$0x3] }
 0x36e   :  { %1422 = vrcp.f32 %v272_v38  ;;  %v1680_v38 = vld [vmem:[%s1848_s4] ss:$0 sm:$0xff]  ;;  %s1542_s4 = smov 126  }
 0x378   :  { %v1423_v39 = vpop.eup %1422 }
 0x379   :  { %v275_v40 = vmul.f32 2.0, %v1423_v39  ;;  %v277_v44 = vmul.f32 %v1423_v39, %v136_v18 }
 0x37b   :  { %v1257_v41 = vadd.f32 -1.0, %v275_v40 }
 0x37d   :  { %279 = vrot.lane.b32.xlu0 %v1257_v41, %s1535_s1  ;;  %v1687_v41 = vld [vmem:[%s1849_s5] ss:$0 sm:$0xff]  ;;  %s1543_s5 = smov 1  }
 0x3ef   :  { %v280_v42 = vpop.permute.xlu0 %279 }
 0x3f0   :  { %v282_v43 = vmul.f32 %v1423_v39, %v280_v42 }
 0x3f2   :  { %284 = vrot.lane.b32.xlu1 %v282_v43, %s1536_s2 }
 0x464   :  { %v285_v45 = vpop.permute.xlu1 %284 }
 0x465   :  { %v287_v46 = vadd.f32 %v285_v45, %v277_v44 }
 0x467   :  { %1424 = vtanh.f32 %v287_v46 }
 0x471   :  { %v1425_v47 = vpop.eup %1424 }
 0x472   :  { %290 = vrot.lane.b32.xlu0 %v1425_v47, %s1540_s3 }
 0x476   :  { %45 = vperm.xlu0 %1408, %v26_v48  }
 0x4e4   :  { %v291_v49 = vpop.permute.xlu0 %290 }
 0x4e5   :  { %v293_v50 = vmul.f32 %v1423_v39, %v291_v49  ;;  %v225_v39 = vmul.f32 0.0, %v1680_v38 }
 0x4e7   :  { %295 = vrot.lane.b32.xlu1 %v293_v50, %s1541_s9  ;;  %v226_v40 = vadd.f32 %v225_v39, %v1631_v33 }
 0x4e9   :  { %v233_v42 = vadd.f32 %v1687_v41, %v226_v40 }
 0x4eb   :  { %v1254_v43 = vmul.f32 -1.442695, %v233_v42 }
 0x4f5   :  { %v46_v51 = vpop.permute.xlu0 %45 }
 0x4f6   :  { %v81_v52 = vmul.f32 %v1590_v2, %v46_v51 }
 0x4f8   :  { %v96_v53 = vadd.f32 %v1595_v3, %v81_v52 }
 0x4fa   :  { %104 = vst [vmem:[#allocation2 + $0x4] sm:$0x3] %v96_v53 }
 0x501   :  { %v405_v56 = vld [vmem:[#allocation2 + $0x4] sm:$0x3] }
 0x559   :  { %v296_v54 = vpop.permute.xlu1 %295 }
 0x55a   :  { %1327 = vmatmul.mubr.msk.f32.vlgmr.msra.gmra.mrb[0].mxu1 %vm146_vm1, %v296_v54 }
 0x55b   :  { %1382 = vmatpush3.bf16.msra.mxu1 %v1608_v22  ;;  %1340 = vmatprep.mubr.msk.f32.mxu1 %vm1538_vm0, %v1539_v23 }
 0x55c   :  { %1386 = vmatprep.subr.bf16.mxu1 %v1537_v21 }
 0x62d   :  { %v1648_v55 = vpop.f32.mrb[0].mxu1 }
 0x62e   :  { %v406_v57 = vadd.f32 %v405_v56, %v1648_v55  ;;  %v1328_v58 = vpop.f32.mrb[1].mxu1 }
 0x630   :  { %v1261_v59 = vmul.f32 -1.442695, %v406_v57 }
 0x632   :  { %1426 = vpow2.f32 %v1261_v59 }
 0x63c   :  { %v1427_v60 = vpop.eup %1426 }
 0x63d   :  { %v410_v61 = vadd.f32 1.0, %v1427_v60 }
 0x63f   :  { %1428 = vrcp.f32 %v410_v61 }
 0x649   :  { %v1429_v62 = vpop.eup %1428 }
 0x64a   :  { %v413_v63 = vmul.f32 2.0, %v1429_v62  ;;  %v415_v6 = vmul.f32 %v1429_v62, %v287_v46 }
 0x64c   :  { %v1262_v0 = vadd.f32 -1.0, %v413_v63 }
 0x64e   :  { %417 = vrot.lane.b32.xlu1 %v1262_v0, %s1535_s1 }
 0x6c0   :  { %v418_v4 = vpop.permute.xlu1 %417 }
 0x6c1   :  { %v420_v5 = vmul.f32 %v1429_v62, %v418_v4 }
 0x6c3   :  { %422 = vrot.lane.b32.xlu0 %v420_v5, %s1536_s2 }
 0x735   :  { %v423_v7 = vpop.permute.xlu0 %422 }
 0x736   :  { %v425_v8 = vadd.f32 %v423_v7, %v415_v6 }
 0x738   :  { %1430 = vtanh.f32 %v425_v8 }
 0x742   :  { %v1431_v9 = vpop.eup %1430 }
 0x743   :  { %428 = vrot.lane.b32.xlu1 %v1431_v9, %s1540_s3 }
 0x747   :  { %50 = vperm.xlu1 %1409, %v27_v10  }
 0x7b5   :  { %v429_v11 = vpop.permute.xlu1 %428 }
 0x7b6   :  { %v431_v12 = vmul.f32 %v1429_v62, %v429_v11 }
 0x7b8   :  { %433 = vrot.lane.b32.xlu0 %v431_v12, %s1541_s9 }
 0x7c6   :  { %v51_v13 = vpop.permute.xlu1 %50 }
 0x7c7   :  { %v82_v14 = vmul.f32 %v1590_v2, %v51_v13 }
 0x7c9   :  { %v97_v15 = vadd.f32 %v1595_v3, %v82_v14 }
 0x7cb   :  { %105 = vst [vmem:[#allocation2 + $0x6] sm:$0x3] %v97_v15 }
 0x7d2   :  { %v543_v18 = vld [vmem:[#allocation2 + $0x6] sm:$0x3] }
 0x82a   :  { %v434_v16 = vpop.permute.xlu0 %433 }
 0x82b   :  { %1334 = vmatmul.mubr.msk.f32.vlgmr.msra.gmra.mrb[2].mxu0 %vm146_vm1, %v434_v16 }
 0x82c   :  { %1385 = vmatpush3.bf16.msra.mxu0 %v1608_v22  ;;  %1347 = vmatprep.mubr.msk.f32.mxu0 %vm1538_vm0, %v1539_v23 }
 0x82d   :  { %1389 = vmatprep.subr.bf16.mxu0 %v1537_v21 }
 0x8fe   :  { %v1665_v17 = vpop.f32.mrb[2].mxu0 }
 0x8ff   :  { %v544_v19 = vadd.f32 %v543_v18, %v1665_v17  ;;  %v1335_v20 = vpop.f32.mrb[3].mxu0 }
 0x901   :  { %v1266_v24 = vmul.f32 -1.442695, %v544_v19 }
 0x903   :  { %1432 = vpow2.f32 %v1266_v24 }
 0x90d   :  { %v1433_v25 = vpop.eup %1432 }
 0x90e   :  { %v548_v26 = vadd.f32 1.0, %v1433_v25 }
 0x910   :  { %1434 = vrcp.f32 %v548_v26 }
 0x91a   :  { %v1435_v27 = vpop.eup %1434 }
 0x91b   :  { %v551_v28 = vmul.f32 2.0, %v1435_v27  ;;  %v553_v32 = vmul.f32 %v1435_v27, %v425_v8 }
 0x91d   :  { %v1267_v29 = vadd.f32 -1.0, %v551_v28 }
 0x91f   :  { %555 = vrot.lane.b32.xlu0 %v1267_v29, %s1535_s1 }
 0x991   :  { %v556_v30 = vpop.permute.xlu0 %555 }
 0x992   :  { %v558_v31 = vmul.f32 %v1435_v27, %v556_v30 }
 0x994   :  { %560 = vrot.lane.b32.xlu1 %v558_v31, %s1536_s2 }
 0xa06   :  { %v561_v34 = vpop.permute.xlu1 %560 }
 0xa07   :  { %v1670_v35 = vadd.f32 %v561_v34, %v553_v32 }
 0xa09   :  { %1436 = vtanh.f32 %v1670_v35 }
 0xa0a   :  { %1438 = vpow2.f32 %v1254_v43 }
 0xa13   :  { %v1437_v36 = vpop.eup %1436 }
 0xa14   :  { %566 = vrot.lane.b32.xlu0 %v1437_v36, %s1540_s3  ;;  %v1439_v44 = vpop.eup %1438 }
 0xa15   :  { %v237_v45 = vadd.f32 1.0, %v1439_v44 }
 0xa17   :  { %1440 = vrcp.f32 %v237_v45 }
 0xa18   :  { %55 = vperm.xlu0 %1408, %v28_v37  }
 0xa21   :  { %v1441_v46 = vpop.eup %1440 }
 0xa22   :  { %v240_v49 = vmul.f32 2.0, %v1441_v46  ;;  %v242_v4 = vmul.f32 0.0, %v1441_v46 }
 0xa24   :  { %v1255_v50 = vadd.f32 -1.0, %v240_v49 }
 0xa86   :  { %v567_v47 = vpop.permute.xlu0 %566 }
 0xa87   :  { %v569_v48 = vmul.f32 %v1435_v27, %v567_v47 }
 0xa89   :  { %571 = vrot.lane.b32.xlu1 %v569_v48, %s1541_s9 }
 0xa8d   :  { %244 = vrot.lane.b32.xlu1 %v1255_v50, %s1542_s4 }
 0xa97   :  { %v56_v33 = vpop.permute.xlu0 %55 }
 0xa98   :  { %v83_v51 = vmul.f32 %v1590_v2, %v56_v33 }
 0xa9a   :  { %v98_v52 = vadd.f32 %v1595_v3, %v83_v51 }
 0xa9c   :  { %106 = vst [vmem:[#allocation2 + $0x8] sm:$0x3] %v98_v52 }
 0xaa3   :  { %v681_v58 = vld [vmem:[#allocation2 + $0x8] sm:$0x3] }
 0xafb   :  { %v572_v53 = vpop.permute.xlu1 %571 }
 0xafc   :  { %1341 = vmatmul.mubr.msk.f32.vlgmr.msra.gmra.mrb[2].mxu1 %vm146_vm1, %v572_v53 }
 0xafd   :  { %1388 = vmatpush3.bf16.msra.mxu1 %v1608_v22  ;;  %1354 = vmatprep.mubr.msk.f32.mxu1 %vm1538_vm0, %v1539_v23 }
 0xafe   :  { %1392 = vmatprep.subr.bf16.mxu1 %v1537_v21  ;;  %v1544_v21 = vmov 67  }
 0xaff   :  { %v245_v54 = vpop.permute.xlu1 %244  ;;  %1410 = vset.pattern.permute.xlu0 %v1544_v21 }
 0xb00   :  { %v247_v56 = vmul.f32 %v1441_v46, %v245_v54 }
 0xb02   :  { %249 = vrot.lane.b32.xlu0 %v247_v56, %s1543_s5 }
 0xb74   :  { %v250_v0 = vpop.permute.xlu0 %249 }
 0xb75   :  { %v252_v5 = vadd.f32 %v250_v0, %v242_v4 }
 0xbcf   :  { %v1700_v57 = vpop.f32.mrb[2].mxu1 }
 0xbd0   :  { %v682_v59 = vadd.f32 %v681_v58, %v1700_v57  ;;  %v1342_v60 = vpop.f32.mrb[3].mxu1 }
 0xbd2   :  { %v1271_v61 = vmul.f32 -1.442695, %v682_v59 }
 0xbd4   :  { %1442 = vpow2.f32 %v1271_v61 }
 0xbde   :  { %v1443_v62 = vpop.eup %1442 }
 0xbdf   :  { %v686_v63 = vadd.f32 1.0, %v1443_v62 }
 0xbe1   :  { %1444 = vrcp.f32 %v686_v63 }
 0xbe2   :  { %1446 = vtanh.f32 %v252_v5 }
 0xbeb   :  { %v1445_v6 = vpop.eup %1444 }
 0xbec   :  { %v689_v7 = vmul.f32 2.0, %v1445_v6  ;;  %v1447_v9 = vpop.eup %1446  ;;  %v691_v14 = vmul.f32 %v1445_v6, %v1670_v35 }
 0xbee   :  { %v1272_v8 = vadd.f32 -1.0, %v689_v7 }
 0xbf0   :  { %693 = vrot.lane.b32.xlu1 %v1272_v8, %s1535_s1 }
 0xbf4   :  { %255 = vrot.lane.b32.xlu1 %v1447_v9, %s1545_s20 }
 0xc62   :  { %v694_v10 = vpop.permute.xlu1 %693 }
 0xc63   :  { %v696_v11 = vmul.f32 %v1445_v6, %v694_v10 }
 0xc65   :  { %698 = vrot.lane.b32.xlu0 %v696_v11, %s1536_s2 }
 0xc66   :  { %v256_v12 = vpop.permute.xlu1 %255 }
 0xc67   :  { %v258_v13 = vmul.f32 %v1441_v46, %v256_v12 }
 0xc69   :  { %262 = vperm.xlu0 %1410, %v258_v13  }
 0xcd7   :  { %v699_v15 = vpop.permute.xlu0 %698 }
 0xcd8   :  { %v1708_v16 = vadd.f32 %v699_v15, %v691_v14 }
 0xcda   :  { %1448 = vtanh.f32 %v1708_v16 }
 0xce4   :  { %v1449_v18 = vpop.eup %1448 }
 0xce5   :  { %704 = vrot.lane.b32.xlu1 %v1449_v18, %s1540_s3 }
 0xce8   :  { %v1712_v19 = vpop.permute.xlu0 %262 }
 0xce9   :  { %v369_v20 = vmul.f32 %v1680_v38, %v1712_v19 }
 0xceb   :  { %v370_v24 = vadd.f32 %v369_v20, %v1648_v55  ;;  %v29_v55 = vld [vmem:[%s1844_s0 + $0xa] sm:$0x3] }
 0xced   :  { %v371_v25 = vadd.f32 %v1687_v41, %v370_v24 }
 0xcef   :  { %v1259_v26 = vmul.f32 -1.442695, %v371_v25 }
 0xcf1   :  { %1450 = vpow2.f32 %v1259_v26 }
 0xcfb   :  { %v1451_v27 = vpop.eup %1450 }
 0xcfc   :  { %v375_v28 = vadd.f32 1.0, %v1451_v27 }
 0xcfe   :  { %1452 = vrcp.f32 %v375_v28 }
 0xd08   :  { %v1453_v29 = vpop.eup %1452 }
 0xd09   :  { %v378_v30 = vmul.f32 2.0, %v1453_v29  ;;  %v380_v39 = vmul.f32 %v1453_v29, %v252_v5 }
 0xd0b   :  { %v1260_v31 = vadd.f32 -1.0, %v378_v30 }
 0xd0d   :  { %382 = vrot.lane.b32.xlu0 %v1260_v31, %s1542_s4 }
 0xd57   :  { %v705_v32 = vpop.permute.xlu1 %704 }
 0xd58   :  { %v707_v34 = vmul.f32 %v1445_v6, %v705_v32 }
 0xd5a   :  { %709 = vrot.lane.b32.xlu1 %v707_v34, %s1541_s9 }
 0xd7f   :  { %v383_v35 = vpop.permute.xlu0 %382 }
 0xd80   :  { %v385_v36 = vmul.f32 %v1453_v29, %v383_v35 }
 0xd82   :  { %387 = vrot.lane.b32.xlu1 %v385_v36, %s1543_s5 }
 0xd86   :  { %60 = vperm.xlu1 %1409, %v29_v55  }
 0xdcc   :  { %v710_v37 = vpop.permute.xlu1 %709 }
 0xdcd   :  { %1348 = vmatmul.mubr.msk.f32.vlgmr.msra.gmra.mrb[4].mxu0 %vm146_vm1, %v710_v37 }
 0xdce   :  { %1391 = vmatpush3.bf16.msra.mxu0 %v1608_v22  ;;  %1361 = vmatprep.mubr.msk.f32.mxu0 %vm1538_vm0, %v1539_v23 }
 0xdf4   :  { %v388_v40 = vpop.permute.xlu1 %387 }
 0xdf5   :  { %v390_v42 = vadd.f32 %v388_v40, %v380_v39 }
 0xdf7   :  { %1454 = vtanh.f32 %v390_v42 }
 0xe01   :  { %v1455_v43 = vpop.eup %1454 }
 0xe02   :  { %393 = vrot.lane.b32.xlu0 %v1455_v43, %s1545_s20 }
 0xe05   :  { %v61_v44 = vpop.permute.xlu1 %60 }
 0xe06   :  { %v84_v45 = vmul.f32 %v1590_v2, %v61_v44 }
 0xe08   :  { %v99_v46 = vadd.f32 %v1595_v3, %v84_v45 }
 0xe0a   :  { %107 = vst [vmem:[#allocation2 + $0xa] sm:$0x3] %v99_v46 }
 0xe11   :  { %v819_v50 = vld [vmem:[#allocation2 + $0xa] sm:$0x3] }
 0xe74   :  { %v394_v47 = vpop.permute.xlu0 %393 }
 0xe75   :  { %v396_v48 = vmul.f32 %v1453_v29, %v394_v47 }
 0xe77   :  { %400 = vperm.xlu0 %1410, %v396_v48  }
 0xea0   :  { %v1731_v49 = vpop.f32.mrb[4].mxu0 }
 0xea1   :  { %v820_v33 = vadd.f32 %v819_v50, %v1731_v49  ;;  %v1349_v51 = vpop.f32.mrb[5].mxu0 }
 0xea3   :  { %v1276_v52 = vmul.f32 -1.442695, %v820_v33 }
 0xea5   :  { %1456 = vpow2.f32 %v1276_v52 }
 0xeaf   :  { %v1457_v53 = vpop.eup %1456 }
 0xeb0   :  { %v824_v54 = vadd.f32 1.0, %v1457_v53 }
 0xeb2   :  { %1458 = vrcp.f32 %v824_v54 }
 0xebc   :  { %v1459_v56 = vpop.eup %1458 }
 0xebd   :  { %v827_v58 = vmul.f32 2.0, %v1459_v56 }
 0xebf   :  { %v1277_v59 = vadd.f32 -1.0, %v827_v58 }
 0xec1   :  { %831 = vrot.lane.b32.xlu1 %v1277_v59, %s1535_s1 }
 0xef6   :  { %v1735_v60 = vpop.permute.xlu0 %400 }
 0xef7   :  { %v507_v61 = vmul.f32 %v1680_v38, %v1735_v60 }
 0xef9   :  { %v508_v62 = vadd.f32 %v507_v61, %v1665_v17  ;;  %v829_v17 = vmul.f32 %v1459_v56, %v1708_v16 }
 0xefb   :  { %v509_v63 = vadd.f32 %v1687_v41, %v508_v62 }
 0xefd   :  { %v1264_v0 = vmul.f32 -1.442695, %v509_v63 }
 0xeff   :  { %1460 = vpow2.f32 %v1264_v0 }
 0xf09   :  { %v1461_v4 = vpop.eup %1460 }
 0xf0a   :  { %v513_v5 = vadd.f32 1.0, %v1461_v4 }
 0xf0c   :  { %1462 = vrcp.f32 %v513_v5 }
 0xf16   :  { %v1463_v6 = vpop.eup %1462 }
 0xf17   :  { %v516_v7 = vmul.f32 2.0, %v1463_v6  ;;  %v518_v18 = vmul.f32 %v1463_v6, %v390_v42 }
 0xf19   :  { %v1265_v8 = vadd.f32 -1.0, %v516_v7 }
 0xf1b   :  { %520 = vrot.lane.b32.xlu0 %v1265_v8, %s1542_s4 }
 0xf33   :  { %v832_v9 = vpop.permute.xlu1 %831 }
 0xf34   :  { %v834_v10 = vmul.f32 %v1459_v56, %v832_v9 }
 0xf36   :  { %836 = vrot.lane.b32.xlu1 %v834_v10, %s1536_s2 }
 0xf8d   :  { %v521_v11 = vpop.permute.xlu0 %520 }
 0xf8e   :  { %v523_v12 = vmul.f32 %v1463_v6, %v521_v11 }
 0xf90   :  { %525 = vrot.lane.b32.xlu0 %v523_v12, %s1543_s5 }
 0xfa8   :  { %v837_v13 = vpop.permute.xlu1 %836 }
 0xfa9   :  { %v1745_v14 = vadd.f32 %v837_v13, %v829_v17 }
 0xfab   :  { %1464 = vtanh.f32 %v1745_v14 }
 0xfb5   :  { %v1465_v15 = vpop.eup %1464 }
 0xfb6   :  { %842 = vrot.lane.b32.xlu1 %v1465_v15, %s1540_s3 }
0x1002   :  { %v526_v20 = vpop.permute.xlu0 %525 }
0x1003   :  { %v528_v24 = vadd.f32 %v526_v20, %v518_v18 }
0x1005   :  { %1466 = vtanh.f32 %v528_v24 }
0x100f   :  { %v1467_v25 = vpop.eup %1466 }
0x1010   :  { %531 = vrot.lane.b32.xlu0 %v1467_v25, %s1545_s20 }
0x1028   :  { %v843_v26 = vpop.permute.xlu1 %842 }
0x1029   :  { %v845_v27 = vmul.f32 %v1459_v56, %v843_v26 }
0x102b   :  { %847 = vrot.lane.b32.xlu1 %v845_v27, %s1541_s9 }
0x1082   :  { %v532_v16 = vpop.permute.xlu0 %531 }
0x1083   :  { %v534_v28 = vmul.f32 %v1463_v6, %v532_v16 }
0x1085   :  { %538 = vperm.xlu0 %1410, %v534_v28  }
0x109d   :  { %v848_v29 = vpop.permute.xlu1 %847 }
0x109e   :  { %1355 = vmatmul.mubr.msk.f32.vlgmr.msra.gmra.mrb[4].mxu1 %vm146_vm1, %v848_v29 }
0x109f   :  { %1394 = vmatpush3.bf16.msra.mxu1 %v1608_v22  ;;  %1368 = vmatprep.mubr.msk.f32.mxu1 %vm1538_vm0, %v1539_v23  ;;  %v30_v23 = vld [vmem:[%s1844_s0 + $0xc] sm:$0x3] }
0x1104   :  { %v1755_v30 = vpop.permute.xlu0 %538 }
0x1105   :  { %v645_v31 = vmul.f32 %v1680_v38, %v1755_v30 }
0x1107   :  { %v646_v32 = vadd.f32 %v645_v31, %v1700_v57  ;;  %v31_v31 = vld [vmem:[%s1844_s0 + $0xe] sm:$0x3]  ;;  %s1546_s0 = smov [#allocation3]  }
0x1109   :  { %v647_v34 = vadd.f32 %v1687_v41, %v646_v32 }
0x110b   :  { %v1269_v35 = vmul.f32 -1.442695, %v647_v34 }
0x110d   :  { %1468 = vpow2.f32 %v1269_v35 }
0x1117   :  { %v1469_v36 = vpop.eup %1468 }
0x1118   :  { %v651_v55 = vadd.f32 1.0, %v1469_v36 }
0x111a   :  { %1470 = vrcp.f32 %v651_v55 }
0x1124   :  { %v1471_v37 = vpop.eup %1470 }
0x1125   :  { %v654_v39 = vmul.f32 2.0, %v1471_v37  ;;  %v656_v56 = vmul.f32 %v1471_v37, %v528_v24 }
0x1127   :  { %v1270_v22 = vadd.f32 -1.0, %v654_v39 }
0x1129   :  { %658 = vrot.lane.b32.xlu1 %v1270_v22, %s1542_s4 }
0x112d   :  { %65 = vperm.xlu1 %1409, %v30_v23  }
0x1131   :  { %1411 = vset.pattern.permute.xlu1 %v1544_v21 }
0x1171   :  { %v1766_v57 = vpop.f32.mrb[4].mxu1 }
0x1172   :  { %v1356_v40 = vpop.f32.mrb[5].mxu1 }
0x119b   :  { %v659_v42 = vpop.permute.xlu1 %658 }
0x119c   :  { %v661_v43 = vmul.f32 %v1471_v37, %v659_v42 }
0x119e   :  { %663 = vrot.lane.b32.xlu0 %v661_v43, %s1543_s5 }
0x11ac   :  { %v66_v44 = vpop.permute.xlu1 %65 }
0x11ad   :  { %v85_v45 = vmul.f32 %v1590_v2, %v66_v44 }
0x11af   :  { %v100_v46 = vadd.f32 %v1595_v3, %v85_v45 }
0x11b1   :  { %108 = vst [vmem:[#allocation2 + $0xc] sm:$0x3] %v100_v46 }
0x11b8   :  { %v957_v47 = vld [vmem:[#allocation2 + $0xc] sm:$0x3] }
0x11b9   :  { %v958_v48 = vadd.f32 %v957_v47, %v1766_v57 }
0x11bb   :  { %v1281_v50 = vmul.f32 -1.442695, %v958_v48 }
0x11bd   :  { %1472 = vpow2.f32 %v1281_v50 }
0x11c7   :  { %v1473_v33 = vpop.eup %1472 }
0x11c8   :  { %v962_v51 = vadd.f32 1.0, %v1473_v33 }
0x11ca   :  { %1474 = vrcp.f32 %v962_v51 }
0x11d4   :  { %v1475_v52 = vpop.eup %1474 }
0x11d5   :  { %v965_v53 = vmul.f32 2.0, %v1475_v52  ;;  %v967_v5 = vmul.f32 %v1475_v52, %v1745_v14 }
0x11d7   :  { %v1282_v54 = vadd.f32 -1.0, %v965_v53 }
0x11d9   :  { %969 = vrot.lane.b32.xlu1 %v1282_v54, %s1535_s1 }
0x1210   :  { %v664_v58 = vpop.permute.xlu0 %663 }
0x1211   :  { %v666_v59 = vadd.f32 %v664_v58, %v656_v56 }
0x1213   :  { %1476 = vtanh.f32 %v666_v59 }
0x121d   :  { %v1477_v61 = vpop.eup %1476 }
0x121e   :  { %669 = vrot.lane.b32.xlu0 %v1477_v61, %s1545_s20 }
0x124b   :  { %v970_v62 = vpop.permute.xlu1 %969 }
0x124c   :  { %v972_v63 = vmul.f32 %v1475_v52, %v970_v62 }
0x124e   :  { %974 = vrot.lane.b32.xlu1 %v972_v63, %s1536_s2 }
0x1290   :  { %v670_v0 = vpop.permute.xlu0 %669 }
0x1291   :  { %v672_v4 = vmul.f32 %v1471_v37, %v670_v0 }
0x1293   :  { %676 = vperm.xlu0 %1410, %v672_v4  }
0x1297   :  { %1412 = vset.pattern.permute.xlu0 %v1534_v1 }
0x12c0   :  { %v975_v6 = vpop.permute.xlu1 %974 }
0x12c1   :  { %v1777_v7 = vadd.f32 %v975_v6, %v967_v5 }
0x12c3   :  { %1478 = vtanh.f32 %v1777_v7 }
0x12cd   :  { %v1479_v8 = vpop.eup %1478 }
0x12ce   :  { %980 = vrot.lane.b32.xlu1 %v1479_v8, %s1540_s3 }
0x1312   :  { %v1781_v9 = vpop.permute.xlu0 %676 }
0x1313   :  { %v783_v10 = vmul.f32 %v1680_v38, %v1781_v9 }
0x1315   :  { %v784_v11 = vadd.f32 %v783_v10, %v1731_v49 }
0x1317   :  { %v785_v12 = vadd.f32 %v1687_v41, %v784_v11 }
0x1319   :  { %v1274_v1 = vmul.f32 -1.442695, %v785_v12 }
0x131b   :  { %1480 = vpow2.f32 %v1274_v1 }
0x1325   :  { %v1481_v17 = vpop.eup %1480 }
0x1326   :  { %v789_v13 = vadd.f32 1.0, %v1481_v17 }
0x1328   :  { %1482 = vrcp.f32 %v789_v13 }
0x1332   :  { %v1483_v14 = vpop.eup %1482 }
0x1333   :  { %v792_v15 = vmul.f32 2.0, %v1483_v14  ;;  %v794_v27 = vmul.f32 %v1483_v14, %v666_v59 }
0x1335   :  { %v1275_v18 = vadd.f32 -1.0, %v792_v15 }
0x1337   :  { %796 = vrot.lane.b32.xlu0 %v1275_v18, %s1542_s4 }
0x1340   :  { %v981_v20 = vpop.permute.xlu1 %980 }
0x1341   :  { %v983_v24 = vmul.f32 %v1475_v52, %v981_v20 }
0x1343   :  { %985 = vrot.lane.b32.xlu1 %v983_v24, %s1541_s9 }
0x13a9   :  { %v797_v25 = vpop.permute.xlu0 %796 }
0x13aa   :  { %v799_v26 = vmul.f32 %v1483_v14, %v797_v25 }
0x13ac   :  { %801 = vrot.lane.b32.xlu0 %v799_v26, %s1543_s5 }
0x13b5   :  { %v986_v49 = vpop.permute.xlu1 %985 }
0x13b6   :  { %1362 = vmatmul.mubr.msk.f32.vlgmr.msra.gmra.mrb[6].mxu0 %vm146_vm1, %v986_v49 }
0x141e   :  { %v802_v16 = vpop.permute.xlu0 %801 }
0x141f   :  { %v804_v28 = vadd.f32 %v802_v16, %v794_v27 }
0x1421   :  { %1484 = vtanh.f32 %v804_v28 }
0x142b   :  { %v1485_v29 = vpop.eup %1484 }
0x142c   :  { %807 = vrot.lane.b32.xlu0 %v1485_v29, %s1545_s20 }
0x1430   :  { %70 = vperm.xlu0 %1412, %v31_v31  }
0x1434   :  { %1413 = vset.pattern.permute.xlu0 %v1544_v21 }
0x1489   :  { %v1055_v32 = vpop.f32.mrb[6].mxu0 }
0x148a   :  { %v1363_v34 = vpop.f32.mrb[7].mxu0 }
0x149e   :  { %v808_v35 = vpop.permute.xlu0 %807 }
0x149f   :  { %v810_v36 = vmul.f32 %v1483_v14, %v808_v35 }
0x14a1   :  { %814 = vperm.xlu1 %1411, %v810_v36  }
0x14af   :  { %v71_v55 = vpop.permute.xlu0 %70 }
0x14b0   :  { %v86_v37 = vmul.f32 %v1590_v2, %v71_v55 }
0x14b2   :  { %v101_v39 = vadd.f32 %v1595_v3, %v86_v37 }
0x14b4   :  { %109 = vst [vmem:[#allocation2 + $0xe] sm:$0x3] %v101_v39 }
0x14bb   :  { %v1095_v22 = vld [vmem:[#allocation2 + $0xe] sm:$0x3] }
0x14bc   :  { %v1096_v23 = vadd.f32 %v1095_v22, %v1055_v32 }
0x14be   :  { %v1286_v40 = vmul.f32 -1.442695, %v1096_v23 }
0x14c0   :  { %1486 = vpow2.f32 %v1286_v40 }
0x14ca   :  { %v1487_v42 = vpop.eup %1486 }
0x14cb   :  { %v1100_v43 = vadd.f32 1.0, %v1487_v42 }
0x14cd   :  { %1488 = vrcp.f32 %v1100_v43 }
0x14d7   :  { %v1489_v44 = vpop.eup %1488 }
0x14d8   :  { %v1103_v21 = vmul.f32 2.0, %v1489_v44 }
0x14da   :  { %v1287_v45 = vadd.f32 -1.0, %v1103_v21 }
0x14dc   :  { %1107 = vrot.lane.b32.xlu0 %v1287_v45, %s1535_s1  ;;  %s1239_s1 = sshll.u32 %s1546_s0, 4  ;;  %s1240_s1 = int_to_ptr.vmem [resolvable:$true] %s1239_s1 }
0x14dd   :  { %p1515_p1 = scmp.lt.s32.totalorder %s1240_s1, %s1240_s1 }
0x1520   :  { %v1799_v46 = vpop.permute.xlu1 %814 }
0x1521   :  { %v921_v2 = vmul.f32 %v1680_v38, %v1799_v46 }
0x1523   :  { %v922_v3 = vadd.f32 %v921_v2, %v1766_v57  ;;  %v1105_v57 = vmul.f32 %v1489_v44, %v1777_v7 }
0x1525   :  { %v923_v47 = vadd.f32 %v1687_v41, %v922_v3 }
0x1527   :  { %v1279_v48 = vmul.f32 -1.442695, %v923_v47 }
0x1529   :  { %1490 = vpow2.f32 %v1279_v48 }
0x1533   :  { %v1491_v50 = vpop.eup %1490 }
0x1534   :  { %v927_v33 = vadd.f32 1.0, %v1491_v50 }
0x1536   :  { %1492 = vrcp.f32 %v927_v33  ;;  %v114_v33 = vlaneseq }
0x1540   :  { %v1493_v51 = vpop.eup %1492 }
0x1541   :  { %v930_v52 = vmul.f32 2.0, %v1493_v51  ;;  %v932_v0 = vmul.f32 %v1493_v51, %v804_v28 }
0x1543   :  { %v1280_v53 = vadd.f32 -1.0, %v930_v52 }
0x1545   :  { %934 = vrot.lane.b32.xlu1 %v1280_v53, %s1542_s4 }
0x154e   :  { %v1108_v54 = vpop.permute.xlu0 %1107 }
0x154f   :  { %v1110_v56 = vmul.f32 %v1489_v44, %v1108_v54 }
0x1551   :  { %1112 = vrot.lane.b32.xlu0 %v1110_v56, %s1536_s2  ;;  %s1510_s2 = scalar_lea.vmem %s1240_s1, 32 }
0x1552   :  { %p1511_p0 = scmp.ne.s32.totalorder %s1240_s1, %s1510_s2  ;;  %p1516_p2 = scmp.lt.s32.totalorder %s1510_s2, %s1510_s2 }
0x1554   :  { %p1517_p3 = por %p1516_p2, %p1515_p1 }
0x1556   :  { %p1518_p4 = pnand %p1517_p3, %p1511_p0 }
0x15b7   :  { %v935_v58 = vpop.permute.xlu1 %934 }
0x15b8   :  { %v937_v59 = vmul.f32 %v1493_v51, %v935_v58 }
0x15ba   :  { %939 = vrot.lane.b32.xlu1 %v937_v59, %s1543_s5 }
0x15c3   :  { %v1113_v61 = vpop.permute.xlu0 %1112 }
0x15c4   :  { %v1115_v62 = vadd.f32 %v1113_v61, %v1105_v57 }
0x15c6   :  { %1494 = vtanh.f32 %v1115_v62 }
0x15d0   :  { %v1495_v63 = vpop.eup %1494 }
0x15d1   :  { %1118 = vrot.lane.b32.xlu0 %v1495_v63, %s1540_s3 }
0x162c   :  { %v940_v4 = vpop.permute.xlu1 %939 }
0x162d   :  { %v942_v5 = vadd.f32 %v940_v4, %v932_v0 }
0x162f   :  { %1496 = vtanh.f32 %v942_v5 }
0x1639   :  { %v1497_v6 = vpop.eup %1496 }
0x163a   :  { %945 = vrot.lane.b32.xlu1 %v1497_v6, %s1545_s20 }
0x1643   :  { %v1119_v11 = vpop.permute.xlu0 %1118 }
0x1644   :  { %v1121_v12 = vmul.f32 %v1489_v44, %v1119_v11 }
0x16ac   :  { %v946_v8 = vpop.permute.xlu1 %945 }
0x16ad   :  { %v948_v10 = vmul.f32 %v1493_v51, %v946_v8  ;;  %v115_v51 = vand.u32 127, %v114_v33 }
0x16af   :  { %952 = vperm.xlu1 %1411, %v948_v10   ;;  %vm259_vm2 = vcmp.eq.s32.totalorder %v115_v51, 0  ;;  %vm397_vm3 = vcmp.eq.s32.totalorder %v115_v51, 1  ;;  %vm535_vm4 = vcmp.eq.s32.totalorder %v115_v51, 2  ;;  %vm673_vm5 = vcmp.eq.s32.totalorder %v115_v51, 3 }
0x16b0   :  { %v265_v52 = vsel %vm259_vm2, %v1712_v19, 0.0  ;;  %vm811_vm6 = vcmp.eq.s32.totalorder %v115_v51, 4  ;;  %vm949_vm7 = vcmp.eq.s32.totalorder %v115_v51, 5  ;;  %vm1087_vm8 = vcmp.eq.s32.totalorder %v115_v51, 6 }
0x16b1   :  { %v403_v53 = vsel %vm397_vm3, %v1735_v60, %v265_v52  ;;  %vm1224_vm9 = vcmp.eq.s32.totalorder %v115_v51, 7 }
0x16b2   :  { %v541_v54 = vsel %vm535_vm4, %v1755_v30, %v403_v53 }
0x16b3   :  { %1124 = vrot.lane.b32.xlu1 %v1121_v12, %s1541_s9  ;;  %v679_v56 = vsel %vm673_vm5, %v1781_v9, %v541_v54 }
0x16b4   :  { %v817_v58 = vsel %vm811_vm6, %v1799_v46, %v679_v56 }
0x172e   :  { %v1812_v7 = vpop.permute.xlu1 %952 }
0x172f   :  { %v1059_v1 = vmul.f32 %v1680_v38, %v1812_v7  ;;  %v955_v59 = vsel %vm949_vm7, %v1812_v7, %v817_v58 }
0x1731   :  { %v1060_v17 = vadd.f32 %v1059_v1, %v1055_v32 }
0x1732   :  { %v1125_v13 = vpop.permute.xlu1 %1124 }
0x1733   :  { %v1061_v14 = vadd.f32 %v1687_v41, %v1060_v17  ;;  %1369 = vmatmul.mubr.msk.f32.vlgmr.msra.gmra.mrb[6].mxu1 %vm146_vm1, %v1125_v13 }
0x1735   :  { %v1284_v15 = vmul.f32 -1.442695, %v1061_v14 }
0x1737   :  { %1498 = vpow2.f32 %v1284_v15 }
0x1741   :  { %v1499_v18 = vpop.eup %1498 }
0x1742   :  { %v1065_v20 = vadd.f32 1.0, %v1499_v18 }
0x1744   :  { %1500 = vrcp.f32 %v1065_v20 }
0x174e   :  { %v1501_v24 = vpop.eup %1500 }
0x174f   :  { %v1068_v25 = vmul.f32 2.0, %v1501_v24  ;;  %v1070_v29 = vmul.f32 %v1501_v24, %v942_v5 }
0x1751   :  { %v1285_v26 = vadd.f32 -1.0, %v1068_v25 }
0x1753   :  { %1072 = vrot.lane.b32.xlu0 %v1285_v26, %s1542_s4 }
0x17c5   :  { %v1073_v49 = vpop.permute.xlu0 %1072 }
0x17c6   :  { %v1075_v27 = vmul.f32 %v1501_v24, %v1073_v49 }
0x17c8   :  { %1077 = vrot.lane.b32.xlu1 %v1075_v27, %s1543_s5 }
0x1806   :  { %v1194_v16 = vpop.f32.mrb[6].mxu1 }
0x1807   :  { %v1370_v28 = vpop.f32.mrb[7].mxu1 }
0x183a   :  { %v1078_v31 = vpop.permute.xlu1 %1077 }
0x183b   :  { %v1080_v32 = vadd.f32 %v1078_v31, %v1070_v29 }
0x183d   :  { %1502 = vtanh.f32 %v1080_v32 }
0x1847   :  { %v1503_v34 = vpop.eup %1502 }
0x1848   :  { %1083 = vrot.lane.b32.xlu0 %v1503_v34, %s1545_s20 }
0x18ba   :  { %v1084_v35 = vpop.permute.xlu0 %1083 }
0x18bb   :  { %v1086_v36 = vmul.f32 %v1501_v24, %v1084_v35 }
0x18bd   :  { %1090 = vperm.xlu1 %1411, %v1086_v36  }
0x193c   :  { %v1091_v55 = vpop.permute.xlu1 %1090 }
0x193d   :  { %v1122_v37 = vmul.f32 %v1680_v38, %v1091_v55  ;;  %v1093_v57 = vsel %vm1087_vm8, %v1091_v55, %v955_v59 }
0x193f   :  { %v1195_v39 = vadd.f32 %v1194_v16, %v1122_v37 }
0x1941   :  { %v1198_v22 = vadd.f32 %v1687_v41, %v1195_v39 }
0x1943   :  { %v1289_v23 = vmul.f32 -1.442695, %v1198_v22 }
0x1945   :  { %1504 = vpow2.f32 %v1289_v23 }
0x194f   :  { %v1505_v40 = vpop.eup %1504 }
0x1950   :  { %v1202_v42 = vadd.f32 1.0, %v1505_v40 }
0x1952   :  { %1506 = vrcp.f32 %v1202_v42 }
0x195c   :  { %v1507_v43 = vpop.eup %1506 }
0x195d   :  { %v1205_v44 = vmul.f32 2.0, %v1507_v43  ;;  %v1207_v3 = vmul.f32 %v1507_v43, %v1080_v32 }
0x195f   :  { %v1290_v21 = vadd.f32 -1.0, %v1205_v44 }
0x1961   :  { %1209 = vrot.lane.b32.xlu0 %v1290_v21, %s1542_s4 }
0x19d3   :  { %v1210_v45 = vpop.permute.xlu0 %1209 }
0x19d4   :  { %v1212_v2 = vmul.f32 %v1507_v43, %v1210_v45 }
0x19d6   :  { %1214 = vrot.lane.b32.xlu1 %v1212_v2, %s1543_s5 }
0x1a48   :  { %v1215_v47 = vpop.permute.xlu1 %1214 }
0x1a49   :  { %v1217_v38 = vadd.f32 %v1215_v47, %v1207_v3 }
0x1a4b   :  { %1508 = vtanh.f32 %v1217_v38 }
0x1a55   :  { %v1509_v48 = vpop.eup %1508 }
0x1a56   :  { %1220 = vrot.lane.b32.xlu0 %v1509_v48, %s1545_s20 }
0x1ac8   :  { %v1221_v41 = vpop.permute.xlu0 %1220 }
0x1ac9   :  { %v1223_v50 = vmul.f32 %v1507_v43, %v1221_v41 }
0x1acb   :  { %1227 = vperm.xlu1 %1411, %v1223_v50  }
0x1b4a   :  { %v1228_v19 = vpop.permute.xlu1 %1227 }
0x1b4b   :  { %v1230_v61 = vsel %vm1224_vm9, %v1228_v19, %v1093_v57 }
0x1b4c   :  { %1232 = vst.msk [vmem:[#allocation3] sm:$0x3] %vm1231_vm10, %v1230_v61 }
0x1b4d   :  { %1521 = shalt.err (!%p1518_p4)
}
0x1b4e   :  { %s1522_s29 = scalar_lea.hbm %s1850_s6, 32 }
0x1b4f   :  { %p1523_p5 = scmp.ne.s32.totalorder %s1850_s6, %s1522_s29  ;;  %p1526_p6 = scmp.lt.u32.totalorder %s1522_s29, %s1850_s6 }
0x1b51   :  { %p1528_p7 = pnand %p1526_p6, %p1523_p5 }
0x1b53   :  { %1531 = shalt.err (!%p1528_p7)
}
0x1b54   :  { %1242 = dma.vmem_to_hbm [thread:$0]  %s1240_s1, 32, %s1850_s6, [#allocation4]  }
0x1b55   :  { %1532 = dma.done.wait [#allocation4], 32  }
0x1b56   :  { %1533 = vsyncadd [#allocation4], 4294967264 }
0x1b57   :  { %1246 = vsyncpa [#allocation4], 1 }

</bundles_post_ra>
